<compile_context>
chip_gen: v5e
topology: v5e:2x2
jax: 0.10.0
libtpu: 0.0.40
codegen_flags: <defaults>
</compile_context>

<pallas_src>
import functools
from typing import NamedTuple, Optional

import jax
import jax.numpy as jnp
from jax.experimental import pallas as pl
from jax.experimental.pallas import tpu as pltpu

LN_EPS = 1e-5
NEG_INF = -1e30  # finite stand-in for fairseq's float("-inf") key-padding fill


class EncoderOut(NamedTuple):
    encoder_out: jnp.ndarray
    encoder_padding_mask: jnp.ndarray
    encoder_embedding: jnp.ndarray
    encoder_states: Optional[list]
    src_tokens: Optional[jnp.ndarray]
    src_lengths: Optional[jnp.ndarray]


def _layer_norm(v, g, b):
    mu = jnp.mean(v, axis=-1, keepdims=True)
    var = jnp.mean((v - mu) ** 2, axis=-1, keepdims=True)
    return (v - mu) * jax.lax.rsqrt(var + LN_EPS) * g + b


# -----------------------------------------------------------------------------
# Fused encoder kernel: all layers + final LayerNorm in one pallas_call.
# grid = (batch_blocks, num_layers); x lives in a VMEM f32 scratch across layers.
# -----------------------------------------------------------------------------
def fused_encoder_kernel(*refs, num_heads, seq_len, use_bf16, emit_states):
    if emit_states:
        (x_ref, kbias_ref,
         wqkv_ref, bqkv_ref, wo_ref, bo_ref, ln1g_ref, ln1b_ref,
         w1_ref, b1_ref, w2_ref, b2_ref, ln2g_ref, ln2b_ref,
         fg_ref, fb_ref, out_ref, states_ref, x_scr) = refs
    else:
        (x_ref, kbias_ref,
         wqkv_ref, bqkv_ref, wo_ref, bo_ref, ln1g_ref, ln1b_ref,
         w1_ref, b1_ref, w2_ref, b2_ref, ln2g_ref, ln2b_ref,
         fg_ref, fb_ref, out_ref, x_scr) = refs
        states_ref = None

    l = pl.program_id(1)
    num_layers = pl.num_programs(1)
    M, C = x_scr.shape
    T = seq_len
    bb = M // T                      # batch elements resident in this block
    H = num_heads
    hd = C // H

    @pl.when(l == 0)
    def _():
        x_scr[...] = x_ref[...].astype(jnp.float32)

    def mm(a, w):
        # Weights are already bf16 (host cast) when use_bf16; cast activation once.
        if a.dtype != w.dtype:
            a = a.astype(w.dtype)
        return jnp.dot(a, w, preferred_element_type=jnp.float32)

    x = x_scr[...]                   # (M, C) f32, M = bb * T
    kb = kbias_ref[0]                # (bb, T) additive key-padding bias (0 / -1e30)

    # -------- self-attention block (normalize_before=True) ------------------
    xn = _layer_norm(x, ln1g_ref[0], ln1b_ref[0])
    # Fused QKV projection; head_dim**-0.5 pre-folded into the Q slice of Wqkv/bqkv.
    qkv = mm(xn, wqkv_ref[0]) + bqkv_ref[0]            # (M, 3C)
    q = qkv[:, :C]
    k = qkv[:, C:2 * C]
    v = qkv[:, 2 * C:]

    # Per-batch-element, head-batched attention: score tensor is (H, T, T) per
    # element (no cross-batch entries, no dense (M, M) mask needed).
    attn_rows = []
    for i in range(bb):              # static unroll over batch elements in the block
        r0 = i * T

        def heads(t, r0=r0):
            return jnp.stack(
                [t[r0:r0 + T, h * hd:(h + 1) * hd] for h in range(H)], axis=0)

        q3, k3, v3 = heads(q), heads(k), heads(v)      # (H, T, hd)
        s = jnp.einsum("hqd,hkd->hqk", q3, k3,
                       preferred_element_type=jnp.float32)    # (H, T, T)
        s = s + kb[i:i + 1, :]       # (1, T) broadcasts over heads & query rows
        s = s - jnp.max(s, axis=-1, keepdims=True)
        p = jnp.exp(s)
        p = p * pl.reciprocal(jnp.sum(p, axis=-1, keepdims=True), approx=True)
        if use_bf16:
            p, v3 = p.astype(jnp.bfloat16), v3.astype(jnp.bfloat16)
        o3 = jnp.einsum("hqk,hkd->hqd", p, v3,
                        preferred_element_type=jnp.float32)   # (H, T, hd)
        attn_rows.append(jnp.concatenate([o3[h] for h in range(H)], axis=-1))

    attn = jnp.concatenate(attn_rows, axis=0) if bb > 1 else attn_rows[0]  # (M, C)
    x = x + mm(attn, wo_ref[0]) + bo_ref[0]

    # -------- feed-forward block (normalize_before=True) --------------------
    xn = _layer_norm(x, ln2g_ref[0], ln2b_ref[0])
    h1 = jnp.maximum(mm(xn, w1_ref[0]) + b1_ref[0], 0.0)
    x = x + mm(h1, w2_ref[0]) + b2_ref[0]

    x_scr[...] = x
    if emit_states:
        states_ref[0] = x.astype(states_ref.dtype)

    @pl.when(l == num_layers - 1)
    def _():
        out_ref[...] = _layer_norm(x, fg_ref[...], fb_ref[...]).astype(out_ref.dtype)


# -----------------------------------------------------------------------------
# Parameter / mask preparation (one-time host-side transforms)
# -----------------------------------------------------------------------------
def _stack_and_fold_params(params, num_heads, use_bf16):
    layers = params["layers"]
    C = layers[0]["wq"].shape[0]
    scale = float(C // num_heads) ** -0.5
    wdt = jnp.bfloat16 if use_bf16 else jnp.float32

    def stack(fn):
        return jnp.stack([fn(lp) for lp in layers], axis=0)

    # Fused QKV weight (C, 3C); query scaling folded into the Q slice.
    wqkv = stack(lambda p: jnp.concatenate(
        [p["wq"] * scale, p["wk"], p["wv"]], axis=1)).astype(wdt)
    bqkv = stack(lambda p: jnp.concatenate(
        [p["bq"] * scale, p["bk"], p["bv"]], axis=1))

    return [
        wqkv, bqkv,
        stack(lambda p: p["wo"]).astype(wdt), stack(lambda p: p["bo"]),
        stack(lambda p: p["ln1_g"]), stack(lambda p: p["ln1_b"]),
        stack(lambda p: p["w1"]).astype(wdt), stack(lambda p: p["b1"]),
        stack(lambda p: p["w2"]).astype(wdt), stack(lambda p: p["b2"]),
        stack(lambda p: p["ln2_g"]), stack(lambda p: p["ln2_b"]),
    ]


def _key_padding_bias(padding_mask, nb, bb, T):
    """(nb, bb, T) additive key-padding bias (0 for keep, NEG_INF for pad)."""
    kb = jnp.where(padding_mask, NEG_INF, 0.0).astype(jnp.float32)
    return kb.reshape(nb, bb, T)


# -----------------------------------------------------------------------------
# Forward wrapper
# -----------------------------------------------------------------------------
def self_att_encoder_forward(embedding, padding_mask, params, num_heads,
                             return_all_hiddens=False, batch_block=None,
                             use_bf16=False):
    """embedding: (B, T, C); padding_mask: (B, T) bool (True = pad).

    batch_block: batch elements resident per grid step.  None -> all of B (nb = 1),
    which is best for single-TensorCore v5e/v6e (max resident M, weights streamed
    once).  On v7x (2 TensorCores) pass batch_block = B // 2 so the "parallel" grid
    axis has 2 programs and both cores are used.
    """
    B, T, C = embedding.shape
    L = len(params["layers"])
    assert C % num_heads == 0
    bb = B if batch_block is None else batch_block
    assert B % bb == 0
    nb = B // bb
    M = bb * T

    x2d = embedding.reshape(B * T, C)
    kbias = _key_padding_bias(padding_mask, nb, bb, T)
    stacked = _stack_and_fold_params(params, num_heads, use_bf16)

    def layer_spec(arr):
        n = arr.ndim - 1
        return pl.BlockSpec((1,) + arr.shape[1:],
                            lambda b, l, n=n: (l,) + (0,) * n)

    in_specs = (
        [  # x and key bias are constant along the layer axis -> single buffer.
         pl.BlockSpec((M, C), lambda b, l: (b, 0),
                      pipeline_mode=pl.Buffered(1)),
         pl.BlockSpec((1, bb, T), lambda b, l: (b, 0, 0),
                      pipeline_mode=pl.Buffered(1))]
        + [layer_spec(w) for w in stacked]                  # per-layer weights
        + [pl.BlockSpec((1, C), lambda b, l: (0, 0)),       # final LN gamma
           pl.BlockSpec((1, C), lambda b, l: (0, 0))]       # final LN beta
    )

    out_shape = [jax.ShapeDtypeStruct((B * T, C), embedding.dtype)]
    out_specs = [pl.BlockSpec((M, C), lambda b, l: (b, 0))]
    if return_all_hiddens:
        out_shape.append(jax.ShapeDtypeStruct((L, B * T, C), embedding.dtype))
        out_specs.append(pl.BlockSpec((1, M, C), lambda b, l: (l, b, 0)))

    kernel = functools.partial(fused_encoder_kernel, num_heads=num_heads,
                               seq_len=T, use_bf16=use_bf16,
                               emit_states=return_all_hiddens)

    # Leave headroom for compiler scratch: 3/4 of physical VMEM (48 MiB on v7x,
    # 96 MiB on v5e/v6e); fall back to a conservative 48 MiB.
    try:
        vmem_limit = int(pltpu.get_tpu_info().vmem_capacity_bytes * 3 // 4)
    except Exception:
        vmem_limit = 48 * 1024 * 1024

    outs = pl.pallas_call(
        kernel,
        grid=(nb, L),
        in_specs=in_specs,
        out_specs=tuple(out_specs) if return_all_hiddens else out_specs[0],
        out_shape=tuple(out_shape) if return_all_hiddens else out_shape[0],
        scratch_shapes=[pltpu.VMEM((M, C), jnp.float32)],
        compiler_params=pltpu.CompilerParams(
            dimension_semantics=("parallel", "arbitrary"),
            vmem_limit_bytes=vmem_limit),
    )(x2d, kbias, *stacked, params["final_ln_g"], params["final_ln_b"])

    if return_all_hiddens:
        y2d, states2d = outs
        states = jnp.transpose(states2d.reshape(L, B, T, C), (0, 2, 1, 3))
        encoder_states = [states[i] for i in range(L)]
    else:
        y2d = outs
        encoder_states = None

    x = y2d.reshape(B, T, C)
    encoder_out = jnp.transpose(x, (1, 0, 2))               # fairseq (T, B, C)
    return EncoderOut(encoder_out=encoder_out,
                      encoder_padding_mask=padding_mask,
                      encoder_embedding=embedding,
                      encoder_states=encoder_states,
                      src_tokens=None, src_lengths=None)


# -----------------------------------------------------------------------------
# Deterministic synthetic parameters (shapes follow TransformerEncoderLayer)
# -----------------------------------------------------------------------------
def init_params(key, num_layers, C, F):
    def w(k, shape):
        return (0.02 * jax.random.normal(k, shape)).astype(jnp.float32)

    layers = []
    for i in range(num_layers):
        ks = jax.random.split(jax.random.fold_in(key, i), 6)
        layers.append(dict(
            wq=w(ks[0], (C, C)), bq=jnp.zeros((1, C), jnp.float32),
            wk=w(ks[1], (C, C)), bk=jnp.zeros((1, C), jnp.float32),
            wv=w(ks[2], (C, C)), bv=jnp.zeros((1, C), jnp.float32),
            wo=w(ks[3], (C, C)), bo=jnp.zeros((1, C), jnp.float32),
            ln1_g=jnp.ones((1, C), jnp.float32), ln1_b=jnp.zeros((1, C), jnp.float32),
            w1=w(ks[4], (C, F)), b1=jnp.zeros((1, F), jnp.float32),
            w2=w(ks[5], (F, C)), b2=jnp.zeros((1, C), jnp.float32),
            ln2_g=jnp.ones((1, C), jnp.float32), ln2_b=jnp.zeros((1, C), jnp.float32),
        ))
    return dict(layers=layers,
                final_ln_g=jnp.ones((1, C), jnp.float32),
                final_ln_b=jnp.zeros((1, C), jnp.float32))


# -----------------------------------------------------------------------------
# Pure-JAX reference (for numerical validation of the fused kernel)
# -----------------------------------------------------------------------------
def reference_forward(embedding, padding_mask, params, num_heads):
    x = embedding.astype(jnp.float32)
    B, T, C = x.shape
    hd = C // num_heads
    scale = hd ** -0.5
    kbias = jnp.where(padding_mask, NEG_INF, 0.0)[:, None, None, :]
    for p in params["layers"]:
        res = x
        xn = _layer_norm(x, p["ln1_g"], p["ln1_b"])
        q = (xn @ p["wq"] + p["bq"]) * scale
        k = xn @ p["wk"] + p["bk"]
        v = xn @ p["wv"] + p["bv"]

        def split(t):
            return t.reshape(B, T, num_heads, hd).transpose(0, 2, 1, 3)

        qh, kh, vh = split(q), split(k), split(v)
        s = jnp.einsum("bhqd,bhkd->bhqk", qh, kh) + kbias
        a = jax.nn.softmax(s, axis=-1)
        o = jnp.einsum("bhqk,bhkd->bhqd", a, vh)
        o = o.transpose(0, 2, 1, 3).reshape(B, T, C)
        x = res + (o @ p["wo"] + p["bo"])
        res = x
        xn = _layer_norm(x, p["ln2_g"], p["ln2_b"])
        x = res + (jnp.maximum(xn @ p["w1"] + p["b1"], 0.0) @ p["w2"] + p["b2"])
    x = _layer_norm(x, params["final_ln_g"], params["final_ln_b"])
    return jnp.transpose(x, (1, 0, 2))


if __name__ == "__main__":
    # args: encoder_embed_dim=32, encoder_attention_heads=4,
    #       encoder_ffn_embed_dim=64, latent_layers=2,
    #       encoder_normalize_before=True, dropout=0, encoder_layerdrop=0
    B, T, C, H, F, L = 2, 8, 32, 4, 64, 2

    key = jax.random.PRNGKey(0)
    k_emb, k_par = jax.random.split(key)
    embedding = jax.random.normal(k_emb, (B, T, C), dtype=jnp.float32)
    padding_mask = jnp.zeros((B, T), dtype=bool).at[1, T - 3:].set(True)

    params = init_params(k_par, L, C, F)
    ref = reference_forward(embedding, padding_mask, params, num_heads=H)

    # Default config (nb = 1, whole batch resident): best for v5e/v6e.
    out = self_att_encoder_forward(embedding, padding_mask, params, num_heads=H)
    jax.block_until_ready(out.encoder_out)
    assert out.encoder_out.shape == (T, B, C)
    assert bool(jnp.all(jnp.isfinite(out.encoder_out)))
    max_err = float(jnp.max(jnp.abs(out.encoder_out - ref)))
    assert max_err < 2e-2, f"mismatch vs reference (nb=1): {max_err}"

    # Split-batch config (nb = 2 parallel grid steps): the v7x two-TensorCore path.
    out2 = self_att_encoder_forward(embedding, padding_mask, params, num_heads=H,
                                    batch_block=1)
    jax.block_until_ready(out2.encoder_out)
    max_err2 = float(jnp.max(jnp.abs(out2.encoder_out - ref)))
    assert max_err2 < 2e-2, f"mismatch vs reference (nb=2): {max_err2}"

    print("KERNEL_OK")
</pallas_src>

<mosaic_0001>
module attributes {stable_mosaic.version = 11 : i64} {
  func.func @fused_encoder_kernel(%arg0: i32, %arg1: i32, %arg2: memref<16x32xf32, #tpu.memory_space<vmem>>, %arg3: memref<1x2x8xf32, #tpu.memory_space<vmem>>, %arg4: memref<1x32x96xf32, #tpu.memory_space<vmem>>, %arg5: memref<1x1x96xf32, #tpu.memory_space<vmem>>, %arg6: memref<1x32x32xf32, #tpu.memory_space<vmem>>, %arg7: memref<1x1x32xf32, #tpu.memory_space<vmem>>, %arg8: memref<1x1x32xf32, #tpu.memory_space<vmem>>, %arg9: memref<1x1x32xf32, #tpu.memory_space<vmem>>, %arg10: memref<1x32x64xf32, #tpu.memory_space<vmem>>, %arg11: memref<1x1x64xf32, #tpu.memory_space<vmem>>, %arg12: memref<1x64x32xf32, #tpu.memory_space<vmem>>, %arg13: memref<1x1x32xf32, #tpu.memory_space<vmem>>, %arg14: memref<1x1x32xf32, #tpu.memory_space<vmem>>, %arg15: memref<1x1x32xf32, #tpu.memory_space<vmem>>, %arg16: memref<1x32xf32, #tpu.memory_space<vmem>>, %arg17: memref<1x32xf32, #tpu.memory_space<vmem>>, %arg18: memref<16x32xf32, #tpu.memory_space<vmem>>, %arg19: memref<16x32xf32, #tpu.memory_space<vmem>>) attributes {dimension_semantics = [#tpu.dimension_semantics<parallel>, #tpu.dimension_semantics<arbitrary>], iteration_bounds = array<i64: 1, 2>, scalar_prefetch = 0 : i64, scratch_operands = 1 : i64, tpu.core_type = #tpu.core_type<tc>, window_params = [{pipeline_mode = #tpu.pipeline_mode<synchronous>, transform_indices = @transform_0, window_bounds = array<i64: 16, 32>}, {pipeline_mode = #tpu.pipeline_mode<synchronous>, transform_indices = @transform_1, window_bounds = array<i64: 1, 2, 8>}, {transform_indices = @transform_2, window_bounds = array<i64: 1, 32, 96>}, {transform_indices = @transform_3, window_bounds = array<i64: 1, 1, 96>}, {transform_indices = @transform_4, window_bounds = array<i64: 1, 32, 32>}, {transform_indices = @transform_5, window_bounds = array<i64: 1, 1, 32>}, {transform_indices = @transform_6, window_bounds = array<i64: 1, 1, 32>}, {transform_indices = @transform_7, window_bounds = array<i64: 1, 1, 32>}, {transform_indices = @transform_8, window_bounds = array<i64: 1, 32, 64>}, {transform_indices = @transform_9, window_bounds = array<i64: 1, 1, 64>}, {transform_indices = @transform_10, window_bounds = array<i64: 1, 64, 32>}, {transform_indices = @transform_11, window_bounds = array<i64: 1, 1, 32>}, {transform_indices = @transform_12, window_bounds = array<i64: 1, 1, 32>}, {transform_indices = @transform_13, window_bounds = array<i64: 1, 1, 32>}, {pipeline_mode = #tpu.pipeline_mode<synchronous>, transform_indices = @transform_14, window_bounds = array<i64: 1, 32>}, {pipeline_mode = #tpu.pipeline_mode<synchronous>, transform_indices = @transform_15, window_bounds = array<i64: 1, 32>}, {transform_indices = @transform_16, window_bounds = array<i64: 16, 32>}]} {
    %c0_i32 = arith.constant 0 : i32
    %0 = arith.cmpi eq, %arg1, %c0_i32 : i32
    %1 = arith.extui %0 : i1 to i32
    %c0_i32_0 = arith.constant 0 : i32
    %2 = arith.cmpi ne, %1, %c0_i32_0 : i32
    scf.if %2 {
      %c0_66 = arith.constant 0 : index
      %c0_67 = arith.constant 0 : index
      %202 = vector.load %arg2[%c0_66, %c0_67] : memref<16x32xf32, #tpu.memory_space<vmem>>, vector<16x32xf32>
      %c0_68 = arith.constant 0 : index
      %c0_69 = arith.constant 0 : index
      %203 = vector.load %arg19[%c0_68, %c0_69] : memref<16x32xf32, #tpu.memory_space<vmem>>, vector<16x32xf32>
      tpu.vector_store %arg19[%c0_68, %c0_69], %202 {strides = array<i32>} : memref<16x32xf32, #tpu.memory_space<vmem>>, vector<16x32xf32>,
    } else {
    }
    %c0 = arith.constant 0 : index
    %c0_1 = arith.constant 0 : index
    %3 = vector.load %arg19[%c0, %c0_1] : memref<16x32xf32, #tpu.memory_space<vmem>>, vector<16x32xf32>
    %c0_2 = arith.constant 0 : index
    %c0_3 = arith.constant 0 : index
    %c0_4 = arith.constant 0 : index
    %4 = vector.load %arg3[%c0_2, %c0_3, %c0_4] : memref<1x2x8xf32, #tpu.memory_space<vmem>>, vector<1x2x8xf32>
    %5 = vector.shape_cast %4 : vector<1x2x8xf32> to vector<2x8xf32>
    %c0_5 = arith.constant 0 : index
    %c0_6 = arith.constant 0 : index
    %c0_7 = arith.constant 0 : index
    %6 = vector.load %arg8[%c0_5, %c0_6, %c0_7] : memref<1x1x32xf32, #tpu.memory_space<vmem>>, vector<1x1x32xf32>
    %7 = vector.shape_cast %6 : vector<1x1x32xf32> to vector<1x32xf32>
    %c0_8 = arith.constant 0 : index
    %c0_9 = arith.constant 0 : index
    %c0_10 = arith.constant 0 : index
    %8 = vector.load %arg9[%c0_8, %c0_9, %c0_10] : memref<1x1x32xf32, #tpu.memory_space<vmem>>, vector<1x1x32xf32>
    %9 = vector.shape_cast %8 : vector<1x1x32xf32> to vector<1x32xf32>
    %cst = arith.constant dense<0.000000e+00> : vector<16xf32>
    %10 = vector.multi_reduction <add>, %3, %cst [1] : vector<16x32xf32> to vector<16xf32>
    %11 = vector.shape_cast %10 : vector<16xf32> to vector<16x1xf32>
    %cst_11 = arith.constant 3.200000e+01 : f32
    %12 = vector.broadcast %cst_11 : f32 to vector<16x1xf32>
    %13 = arith.divf %11, %12 : vector<16x1xf32>
    %14 = vector.broadcast %13 : vector<16x1xf32> to vector<16x32xf32>
    %15 = arith.subf %3, %14 : vector<16x32xf32>
    %16 = arith.mulf %15, %15 : vector<16x32xf32>
    %cst_12 = arith.constant dense<0.000000e+00> : vector<16xf32>
    %17 = vector.multi_reduction <add>, %16, %cst_12 [1] : vector<16x32xf32> to vector<16xf32>
    %18 = vector.shape_cast %17 : vector<16xf32> to vector<16x1xf32>
    %cst_13 = arith.constant 3.200000e+01 : f32
    %19 = vector.broadcast %cst_13 : f32 to vector<16x1xf32>
    %20 = arith.divf %18, %19 : vector<16x1xf32>
    %21 = vector.broadcast %13 : vector<16x1xf32> to vector<16x32xf32>
    %22 = arith.subf %3, %21 : vector<16x32xf32>
    %cst_14 = arith.constant 9.99999974E-6 : f32
    %23 = vector.broadcast %cst_14 : f32 to vector<16x1xf32>
    %24 = arith.addf %20, %23 : vector<16x1xf32>
    %25 = math.rsqrt %24 : vector<16x1xf32>
    %26 = vector.broadcast %25 : vector<16x1xf32> to vector<16x32xf32>
    %27 = arith.mulf %22, %26 : vector<16x32xf32>
    %28 = vector.broadcast %7 : vector<1x32xf32> to vector<16x32xf32>
    %29 = arith.mulf %27, %28 : vector<16x32xf32>
    %30 = vector.broadcast %9 : vector<1x32xf32> to vector<16x32xf32>
    %31 = arith.addf %29, %30 : vector<16x32xf32>
    %c0_15 = arith.constant 0 : index
    %c0_16 = arith.constant 0 : index
    %c0_17 = arith.constant 0 : index
    %32 = vector.load %arg4[%c0_15, %c0_16, %c0_17] : memref<1x32x96xf32, #tpu.memory_space<vmem>>, vector<1x32x96xf32>
    %33 = vector.shape_cast %32 : vector<1x32x96xf32> to vector<32x96xf32>
    %cst_18 = arith.constant dense<0.000000e+00> : vector<16x96xf32>
    %34 = tpu.matmul %31, %33, %cst_18 {dimension_numbers = #tpu.dot_dimension_numbers<[1], [0], [0], [1], [0, 0, 1, 1], [], []>} : vector<16x32xf32>, vector<32x96xf32>, vector<16x96xf32> -> vector<16x96xf32>
    %c0_19 = arith.constant 0 : index
    %c0_20 = arith.constant 0 : index
    %c0_21 = arith.constant 0 : index
    %35 = vector.load %arg5[%c0_19, %c0_20, %c0_21] : memref<1x1x96xf32, #tpu.memory_space<vmem>>, vector<1x1x96xf32>
    %36 = vector.shape_cast %35 : vector<1x1x96xf32> to vector<1x96xf32>
    %37 = vector.broadcast %36 : vector<1x96xf32> to vector<16x96xf32>
    %38 = arith.addf %34, %37 : vector<16x96xf32>
    %39 = vector.extract_strided_slice %38 {offsets = [0, 0], sizes = [16, 32], strides = [1, 1]} : vector<16x96xf32> to vector<16x32xf32>
    %40 = vector.extract_strided_slice %38 {offsets = [0, 32], sizes = [16, 32], strides = [1, 1]} : vector<16x96xf32> to vector<16x32xf32>
    %41 = vector.extract_strided_slice %38 {offsets = [0, 64], sizes = [16, 32], strides = [1, 1]} : vector<16x96xf32> to vector<16x32xf32>
    %42 = vector.extract_strided_slice %39 {offsets = [0, 0], sizes = [8, 8], strides = [1, 1]} : vector<16x32xf32> to vector<8x8xf32>
    %43 = vector.extract_strided_slice %39 {offsets = [0, 8], sizes = [8, 8], strides = [1, 1]} : vector<16x32xf32> to vector<8x8xf32>
    %44 = vector.extract_strided_slice %39 {offsets = [0, 16], sizes = [8, 8], strides = [1, 1]} : vector<16x32xf32> to vector<8x8xf32>
    %45 = vector.extract_strided_slice %39 {offsets = [0, 24], sizes = [8, 8], strides = [1, 1]} : vector<16x32xf32> to vector<8x8xf32>
    %46 = vector.shape_cast %42 : vector<8x8xf32> to vector<1x8x8xf32>
    %47 = vector.shape_cast %43 : vector<8x8xf32> to vector<1x8x8xf32>
    %48 = vector.shape_cast %44 : vector<8x8xf32> to vector<1x8x8xf32>
    %49 = vector.shape_cast %45 : vector<8x8xf32> to vector<1x8x8xf32>
    %50 = tpu.concatenate %46, %47, %48, %49 in 0 : vector<1x8x8xf32>, vector<1x8x8xf32>, vector<1x8x8xf32>, vector<1x8x8xf32> -> vector<4x8x8xf32>
    %51 = vector.extract_strided_slice %40 {offsets = [0, 0], sizes = [8, 8], strides = [1, 1]} : vector<16x32xf32> to vector<8x8xf32>
    %52 = vector.extract_strided_slice %40 {offsets = [0, 8], sizes = [8, 8], strides = [1, 1]} : vector<16x32xf32> to vector<8x8xf32>
    %53 = vector.extract_strided_slice %40 {offsets = [0, 16], sizes = [8, 8], strides = [1, 1]} : vector<16x32xf32> to vector<8x8xf32>
    %54 = vector.extract_strided_slice %40 {offsets = [0, 24], sizes = [8, 8], strides = [1, 1]} : vector<16x32xf32> to vector<8x8xf32>
    %55 = vector.shape_cast %51 : vector<8x8xf32> to vector<1x8x8xf32>
    %56 = vector.shape_cast %52 : vector<8x8xf32> to vector<1x8x8xf32>
    %57 = vector.shape_cast %53 : vector<8x8xf32> to vector<1x8x8xf32>
    %58 = vector.shape_cast %54 : vector<8x8xf32> to vector<1x8x8xf32>
    %59 = tpu.concatenate %55, %56, %57, %58 in 0 : vector<1x8x8xf32>, vector<1x8x8xf32>, vector<1x8x8xf32>, vector<1x8x8xf32> -> vector<4x8x8xf32>
    %60 = vector.extract_strided_slice %41 {offsets = [0, 0], sizes = [8, 8], strides = [1, 1]} : vector<16x32xf32> to vector<8x8xf32>
    %61 = vector.extract_strided_slice %41 {offsets = [0, 8], sizes = [8, 8], strides = [1, 1]} : vector<16x32xf32> to vector<8x8xf32>
    %62 = vector.extract_strided_slice %41 {offsets = [0, 16], sizes = [8, 8], strides = [1, 1]} : vector<16x32xf32> to vector<8x8xf32>
    %63 = vector.extract_strided_slice %41 {offsets = [0, 24], sizes = [8, 8], strides = [1, 1]} : vector<16x32xf32> to vector<8x8xf32>
    %64 = vector.shape_cast %60 : vector<8x8xf32> to vector<1x8x8xf32>
    %65 = vector.shape_cast %61 : vector<8x8xf32> to vector<1x8x8xf32>
    %66 = vector.shape_cast %62 : vector<8x8xf32> to vector<1x8x8xf32>
    %67 = vector.shape_cast %63 : vector<8x8xf32> to vector<1x8x8xf32>
    %68 = tpu.concatenate %64, %65, %66, %67 in 0 : vector<1x8x8xf32>, vector<1x8x8xf32>, vector<1x8x8xf32>, vector<1x8x8xf32> -> vector<4x8x8xf32>
    "tpu.trace_start"() <{level = 10 : i32, message = "hqd,hkd->hqk"}> : () -> ()
    %cst_22 = arith.constant dense<0.000000e+00> : vector<4x8x8xf32>
    %69 = tpu.matmul %50, %59, %cst_22 {dimension_numbers = #tpu.dot_dimension_numbers<[2], [2], [1], [1], [0, 0, 0, 1, 1, 1], [0], [0]>} : vector<4x8x8xf32>, vector<4x8x8xf32>, vector<4x8x8xf32> -> vector<4x8x8xf32>
    "tpu.trace_stop"() : () -> ()
    %70 = vector.extract_strided_slice %5 {offsets = [0, 0], sizes = [1, 8], strides = [1, 1]} : vector<2x8xf32> to vector<1x8xf32>
    %71 = vector.shape_cast %70 : vector<1x8xf32> to vector<1x1x8xf32>
    %72 = vector.broadcast %71 : vector<1x1x8xf32> to vector<4x8x8xf32>
    %73 = arith.addf %69, %72 : vector<4x8x8xf32>
    %cst_23 = arith.constant dense<0xFF800000> : vector<4x8xf32>
    %74 = vector.multi_reduction <maximumf>, %73, %cst_23 [2] : vector<4x8x8xf32> to vector<4x8xf32>
    %75 = vector.shape_cast %74 : vector<4x8xf32> to vector<4x8x1xf32>
    %76 = vector.broadcast %75 : vector<4x8x1xf32> to vector<4x8x8xf32>
    %77 = arith.subf %73, %76 : vector<4x8x8xf32>
    %78 = math.exp %77 : vector<4x8x8xf32>
    %cst_24 = arith.constant dense<0.000000e+00> : vector<4x8xf32>
    %79 = vector.multi_reduction <add>, %78, %cst_24 [2] : vector<4x8x8xf32> to vector<4x8xf32>
    %80 = vector.shape_cast %79 : vector<4x8xf32> to vector<4x8x1xf32>
    %81 = tpu.reciprocal %80 {approx = true} : vector<4x8x1xf32> -> vector<4x8x1xf32>
    %82 = vector.broadcast %81 : vector<4x8x1xf32> to vector<4x8x8xf32>
    %83 = arith.mulf %78, %82 : vector<4x8x8xf32>
    "tpu.trace_start"() <{level = 10 : i32, message = "hqk,hkd->hqd"}> : () -> ()
    %cst_25 = arith.constant dense<0.000000e+00> : vector<4x8x8xf32>
    %84 = tpu.matmul %83, %68, %cst_25 {dimension_numbers = #tpu.dot_dimension_numbers<[2], [1], [1], [2], [0, 0, 0, 1, 1, 2], [0], [0]>} : vector<4x8x8xf32>, vector<4x8x8xf32>, vector<4x8x8xf32> -> vector<4x8x8xf32>
    "tpu.trace_stop"() : () -> ()
    %85 = vector.extract_strided_slice %84 {offsets = [0, 0, 0], sizes = [1, 8, 8], strides = [1, 1, 1]} : vector<4x8x8xf32> to vector<1x8x8xf32>
    %86 = vector.shape_cast %85 : vector<1x8x8xf32> to vector<8x8xf32>
    %87 = vector.extract_strided_slice %84 {offsets = [1, 0, 0], sizes = [1, 8, 8], strides = [1, 1, 1]} : vector<4x8x8xf32> to vector<1x8x8xf32>
    %88 = vector.shape_cast %87 : vector<1x8x8xf32> to vector<8x8xf32>
    %89 = vector.extract_strided_slice %84 {offsets = [2, 0, 0], sizes = [1, 8, 8], strides = [1, 1, 1]} : vector<4x8x8xf32> to vector<1x8x8xf32>
    %90 = vector.shape_cast %89 : vector<1x8x8xf32> to vector<8x8xf32>
    %91 = vector.extract_strided_slice %84 {offsets = [3, 0, 0], sizes = [1, 8, 8], strides = [1, 1, 1]} : vector<4x8x8xf32> to vector<1x8x8xf32>
    %92 = vector.shape_cast %91 : vector<1x8x8xf32> to vector<8x8xf32>
    %93 = tpu.concatenate %86, %88, %90, %92 in 1 : vector<8x8xf32>, vector<8x8xf32>, vector<8x8xf32>, vector<8x8xf32> -> vector<8x32xf32>
    %94 = vector.extract_strided_slice %39 {offsets = [8, 0], sizes = [8, 8], strides = [1, 1]} : vector<16x32xf32> to vector<8x8xf32>
    %95 = vector.extract_strided_slice %39 {offsets = [8, 8], sizes = [8, 8], strides = [1, 1]} : vector<16x32xf32> to vector<8x8xf32>
    %96 = vector.extract_strided_slice %39 {offsets = [8, 16], sizes = [8, 8], strides = [1, 1]} : vector<16x32xf32> to vector<8x8xf32>
    %97 = vector.extract_strided_slice %39 {offsets = [8, 24], sizes = [8, 8], strides = [1, 1]} : vector<16x32xf32> to vector<8x8xf32>
    %98 = vector.shape_cast %94 : vector<8x8xf32> to vector<1x8x8xf32>
    %99 = vector.shape_cast %95 : vector<8x8xf32> to vector<1x8x8xf32>
    %100 = vector.shape_cast %96 : vector<8x8xf32> to vector<1x8x8xf32>
    %101 = vector.shape_cast %97 : vector<8x8xf32> to vector<1x8x8xf32>
    %102 = tpu.concatenate %98, %99, %100, %101 in 0 : vector<1x8x8xf32>, vector<1x8x8xf32>, vector<1x8x8xf32>, vector<1x8x8xf32> -> vector<4x8x8xf32>
    %103 = vector.extract_strided_slice %40 {offsets = [8, 0], sizes = [8, 8], strides = [1, 1]} : vector<16x32xf32> to vector<8x8xf32>
    %104 = vector.extract_strided_slice %40 {offsets = [8, 8], sizes = [8, 8], strides = [1, 1]} : vector<16x32xf32> to vector<8x8xf32>
    %105 = vector.extract_strided_slice %40 {offsets = [8, 16], sizes = [8, 8], strides = [1, 1]} : vector<16x32xf32> to vector<8x8xf32>
    %106 = vector.extract_strided_slice %40 {offsets = [8, 24], sizes = [8, 8], strides = [1, 1]} : vector<16x32xf32> to vector<8x8xf32>
    %107 = vector.shape_cast %103 : vector<8x8xf32> to vector<1x8x8xf32>
    %108 = vector.shape_cast %104 : vector<8x8xf32> to vector<1x8x8xf32>
    %109 = vector.shape_cast %105 : vector<8x8xf32> to vector<1x8x8xf32>
    %110 = vector.shape_cast %106 : vector<8x8xf32> to vector<1x8x8xf32>
    %111 = tpu.concatenate %107, %108, %109, %110 in 0 : vector<1x8x8xf32>, vector<1x8x8xf32>, vector<1x8x8xf32>, vector<1x8x8xf32> -> vector<4x8x8xf32>
    %112 = vector.extract_strided_slice %41 {offsets = [8, 0], sizes = [8, 8], strides = [1, 1]} : vector<16x32xf32> to vector<8x8xf32>
    %113 = vector.extract_strided_slice %41 {offsets = [8, 8], sizes = [8, 8], strides = [1, 1]} : vector<16x32xf32> to vector<8x8xf32>
    %114 = vector.extract_strided_slice %41 {offsets = [8, 16], sizes = [8, 8], strides = [1, 1]} : vector<16x32xf32> to vector<8x8xf32>
    %115 = vector.extract_strided_slice %41 {offsets = [8, 24], sizes = [8, 8], strides = [1, 1]} : vector<16x32xf32> to vector<8x8xf32>
    %116 = vector.shape_cast %112 : vector<8x8xf32> to vector<1x8x8xf32>
    %117 = vector.shape_cast %113 : vector<8x8xf32> to vector<1x8x8xf32>
    %118 = vector.shape_cast %114 : vector<8x8xf32> to vector<1x8x8xf32>
    %119 = vector.shape_cast %115 : vector<8x8xf32> to vector<1x8x8xf32>
    %120 = tpu.concatenate %116, %117, %118, %119 in 0 : vector<1x8x8xf32>, vector<1x8x8xf32>, vector<1x8x8xf32>, vector<1x8x8xf32> -> vector<4x8x8xf32>
    "tpu.trace_start"() <{level = 10 : i32, message = "hqd,hkd->hqk"}> : () -> ()
    %cst_26 = arith.constant dense<0.000000e+00> : vector<4x8x8xf32>
    %121 = tpu.matmul %102, %111, %cst_26 {dimension_numbers = #tpu.dot_dimension_numbers<[2], [2], [1], [1], [0, 0, 0, 1, 1, 1], [0], [0]>} : vector<4x8x8xf32>, vector<4x8x8xf32>, vector<4x8x8xf32> -> vector<4x8x8xf32>
    "tpu.trace_stop"() : () -> ()
    %122 = vector.extract_strided_slice %5 {offsets = [1, 0], sizes = [1, 8], strides = [1, 1]} : vector<2x8xf32> to vector<1x8xf32>
    %123 = vector.shape_cast %122 : vector<1x8xf32> to vector<1x1x8xf32>
    %124 = vector.broadcast %123 : vector<1x1x8xf32> to vector<4x8x8xf32>
    %125 = arith.addf %121, %124 : vector<4x8x8xf32>
    %cst_27 = arith.constant dense<0xFF800000> : vector<4x8xf32>
    %126 = vector.multi_reduction <maximumf>, %125, %cst_27 [2] : vector<4x8x8xf32> to vector<4x8xf32>
    %127 = vector.shape_cast %126 : vector<4x8xf32> to vector<4x8x1xf32>
    %128 = vector.broadcast %127 : vector<4x8x1xf32> to vector<4x8x8xf32>
    %129 = arith.subf %125, %128 : vector<4x8x8xf32>
    %130 = math.exp %129 : vector<4x8x8xf32>
    %cst_28 = arith.constant dense<0.000000e+00> : vector<4x8xf32>
    %131 = vector.multi_reduction <add>, %130, %cst_28 [2] : vector<4x8x8xf32> to vector<4x8xf32>
    %132 = vector.shape_cast %131 : vector<4x8xf32> to vector<4x8x1xf32>
    %133 = tpu.reciprocal %132 {approx = true} : vector<4x8x1xf32> -> vector<4x8x1xf32>
    %134 = vector.broadcast %133 : vector<4x8x1xf32> to vector<4x8x8xf32>
    %135 = arith.mulf %130, %134 : vector<4x8x8xf32>
    "tpu.trace_start"() <{level = 10 : i32, message = "hqk,hkd->hqd"}> : () -> ()
    %cst_29 = arith.constant dense<0.000000e+00> : vector<4x8x8xf32>
    %136 = tpu.matmul %135, %120, %cst_29 {dimension_numbers = #tpu.dot_dimension_numbers<[2], [1], [1], [2], [0, 0, 0, 1, 1, 2], [0], [0]>} : vector<4x8x8xf32>, vector<4x8x8xf32>, vector<4x8x8xf32> -> vector<4x8x8xf32>
    "tpu.trace_stop"() : () -> ()
    %137 = vector.extract_strided_slice %136 {offsets = [0, 0, 0], sizes = [1, 8, 8], strides = [1, 1, 1]} : vector<4x8x8xf32> to vector<1x8x8xf32>
    %138 = vector.shape_cast %137 : vector<1x8x8xf32> to vector<8x8xf32>
    %139 = vector.extract_strided_slice %136 {offsets = [1, 0, 0], sizes = [1, 8, 8], strides = [1, 1, 1]} : vector<4x8x8xf32> to vector<1x8x8xf32>
    %140 = vector.shape_cast %139 : vector<1x8x8xf32> to vector<8x8xf32>
    %141 = vector.extract_strided_slice %136 {offsets = [2, 0, 0], sizes = [1, 8, 8], strides = [1, 1, 1]} : vector<4x8x8xf32> to vector<1x8x8xf32>
    %142 = vector.shape_cast %141 : vector<1x8x8xf32> to vector<8x8xf32>
    %143 = vector.extract_strided_slice %136 {offsets = [3, 0, 0], sizes = [1, 8, 8], strides = [1, 1, 1]} : vector<4x8x8xf32> to vector<1x8x8xf32>
    %144 = vector.shape_cast %143 : vector<1x8x8xf32> to vector<8x8xf32>
    %145 = tpu.concatenate %138, %140, %142, %144 in 1 : vector<8x8xf32>, vector<8x8xf32>, vector<8x8xf32>, vector<8x8xf32> -> vector<8x32xf32>
    %146 = tpu.concatenate %93, %145 in 0 : vector<8x32xf32>, vector<8x32xf32> -> vector<16x32xf32>
    %c0_30 = arith.constant 0 : index
    %c0_31 = arith.constant 0 : index
    %c0_32 = arith.constant 0 : index
    %147 = vector.load %arg6[%c0_30, %c0_31, %c0_32] : memref<1x32x32xf32, #tpu.memory_space<vmem>>, vector<1x32x32xf32>
    %148 = vector.shape_cast %147 : vector<1x32x32xf32> to vector<32x32xf32>
    %cst_33 = arith.constant dense<0.000000e+00> : vector<16x32xf32>
    %149 = tpu.matmul %146, %148, %cst_33 {dimension_numbers = #tpu.dot_dimension_numbers<[1], [0], [0], [1], [0, 0, 1, 1], [], []>} : vector<16x32xf32>, vector<32x32xf32>, vector<16x32xf32> -> vector<16x32xf32>
    %150 = arith.addf %3, %149 : vector<16x32xf32>
    %c0_34 = arith.constant 0 : index
    %c0_35 = arith.constant 0 : index
    %c0_36 = arith.constant 0 : index
    %151 = vector.load %arg7[%c0_34, %c0_35, %c0_36] : memref<1x1x32xf32, #tpu.memory_space<vmem>>, vector<1x1x32xf32>
    %152 = vector.shape_cast %151 : vector<1x1x32xf32> to vector<1x32xf32>
    %153 = vector.broadcast %152 : vector<1x32xf32> to vector<16x32xf32>
    %154 = arith.addf %150, %153 : vector<16x32xf32>
    %c0_37 = arith.constant 0 : index
    %c0_38 = arith.constant 0 : index
    %c0_39 = arith.constant 0 : index
    %155 = vector.load %arg14[%c0_37, %c0_38, %c0_39] : memref<1x1x32xf32, #tpu.memory_space<vmem>>, vector<1x1x32xf32>
    %156 = vector.shape_cast %155 : vector<1x1x32xf32> to vector<1x32xf32>
    %c0_40 = arith.constant 0 : index
    %c0_41 = arith.constant 0 : index
    %c0_42 = arith.constant 0 : index
    %157 = vector.load %arg15[%c0_40, %c0_41, %c0_42] : memref<1x1x32xf32, #tpu.memory_space<vmem>>, vector<1x1x32xf32>
    %158 = vector.shape_cast %157 : vector<1x1x32xf32> to vector<1x32xf32>
    %cst_43 = arith.constant dense<0.000000e+00> : vector<16xf32>
    %159 = vector.multi_reduction <add>, %154, %cst_43 [1] : vector<16x32xf32> to vector<16xf32>
    %160 = vector.shape_cast %159 : vector<16xf32> to vector<16x1xf32>
    %cst_44 = arith.constant 3.200000e+01 : f32
    %161 = vector.broadcast %cst_44 : f32 to vector<16x1xf32>
    %162 = arith.divf %160, %161 : vector<16x1xf32>
    %163 = vector.broadcast %162 : vector<16x1xf32> to vector<16x32xf32>
    %164 = arith.subf %154, %163 : vector<16x32xf32>
    %165 = arith.mulf %164, %164 : vector<16x32xf32>
    %cst_45 = arith.constant dense<0.000000e+00> : vector<16xf32>
    %166 = vector.multi_reduction <add>, %165, %cst_45 [1] : vector<16x32xf32> to vector<16xf32>
    %167 = vector.shape_cast %166 : vector<16xf32> to vector<16x1xf32>
    %cst_46 = arith.constant 3.200000e+01 : f32
    %168 = vector.broadcast %cst_46 : f32 to vector<16x1xf32>
    %169 = arith.divf %167, %168 : vector<16x1xf32>
    %170 = vector.broadcast %162 : vector<16x1xf32> to vector<16x32xf32>
    %171 = arith.subf %154, %170 : vector<16x32xf32>
    %cst_47 = arith.constant 9.99999974E-6 : f32
    %172 = vector.broadcast %cst_47 : f32 to vector<16x1xf32>
    %173 = arith.addf %169, %172 : vector<16x1xf32>
    %174 = math.rsqrt %173 : vector<16x1xf32>
    %175 = vector.broadcast %174 : vector<16x1xf32> to vector<16x32xf32>
    %176 = arith.mulf %171, %175 : vector<16x32xf32>
    %177 = vector.broadcast %156 : vector<1x32xf32> to vector<16x32xf32>
    %178 = arith.mulf %176, %177 : vector<16x32xf32>
    %179 = vector.broadcast %158 : vector<1x32xf32> to vector<16x32xf32>
    %180 = arith.addf %178, %179 : vector<16x32xf32>
    %c0_48 = arith.constant 0 : index
    %c0_49 = arith.constant 0 : index
    %c0_50 = arith.constant 0 : index
    %181 = vector.load %arg10[%c0_48, %c0_49, %c0_50] : memref<1x32x64xf32, #tpu.memory_space<vmem>>, vector<1x32x64xf32>
    %182 = vector.shape_cast %181 : vector<1x32x64xf32> to vector<32x64xf32>
    %cst_51 = arith.constant dense<0.000000e+00> : vector<16x64xf32>
    %183 = tpu.matmul %180, %182, %cst_51 {dimension_numbers = #tpu.dot_dimension_numbers<[1], [0], [0], [1], [0, 0, 1, 1], [], []>} : vector<16x32xf32>, vector<32x64xf32>, vector<16x64xf32> -> vector<16x64xf32>
    %c0_52 = arith.constant 0 : index
    %c0_53 = arith.constant 0 : index
    %c0_54 = arith.constant 0 : index
    %184 = vector.load %arg11[%c0_52, %c0_53, %c0_54] : memref<1x1x64xf32, #tpu.memory_space<vmem>>, vector<1x1x64xf32>
    %185 = vector.shape_cast %184 : vector<1x1x64xf32> to vector<1x64xf32>
    %186 = vector.broadcast %185 : vector<1x64xf32> to vector<16x64xf32>
    %187 = arith.addf %183, %186 : vector<16x64xf32>
    %cst_55 = arith.constant 0.000000e+00 : f32
    %188 = vector.broadcast %cst_55 : f32 to vector<16x64xf32>
    %189 = arith.maximumf %187, %188 : vector<16x64xf32>
    %c0_56 = arith.constant 0 : index
    %c0_57 = arith.constant 0 : index
    %c0_58 = arith.constant 0 : index
    %190 = vector.load %arg12[%c0_56, %c0_57, %c0_58] : memref<1x64x32xf32, #tpu.memory_space<vmem>>, vector<1x64x32xf32>
    %191 = vector.shape_cast %190 : vector<1x64x32xf32> to vector<64x32xf32>
    %cst_59 = arith.constant dense<0.000000e+00> : vector<16x32xf32>
    %192 = tpu.matmul %189, %191, %cst_59 {dimension_numbers = #tpu.dot_dimension_numbers<[1], [0], [0], [1], [0, 0, 1, 1], [], []>} : vector<16x64xf32>, vector<64x32xf32>, vector<16x32xf32> -> vector<16x32xf32>
    %193 = arith.addf %154, %192 : vector<16x32xf32>
    %c0_60 = arith.constant 0 : index
    %c0_61 = arith.constant 0 : index
    %c0_62 = arith.constant 0 : index
    %194 = vector.load %arg13[%c0_60, %c0_61, %c0_62] : memref<1x1x32xf32, #tpu.memory_space<vmem>>, vector<1x1x32xf32>
    %195 = vector.shape_cast %194 : vector<1x1x32xf32> to vector<1x32xf32>
    %196 = vector.broadcast %195 : vector<1x32xf32> to vector<16x32xf32>
    %197 = arith.addf %193, %196 : vector<16x32xf32>
    %c0_63 = arith.constant 0 : index
    %c0_64 = arith.constant 0 : index
    %198 = vector.load %arg19[%c0_63, %c0_64] : memref<16x32xf32, #tpu.memory_space<vmem>>, vector<16x32xf32>
    tpu.vector_store %arg19[%c0_63, %c0_64], %197 {strides = array<i32>} : memref<16x32xf32, #tpu.memory_space<vmem>>, vector<16x32xf32>,
    %c1_i32 = arith.constant 1 : i32
    %199 = arith.cmpi eq, %arg1, %c1_i32 : i32
    %200 = arith.extui %199 : i1 to i32
    %c0_i32_65 = arith.constant 0 : i32
    %201 = arith.cmpi ne, %200, %c0_i32_65 : i32
    scf.if %201 {
      %c0_66 = arith.constant 0 : index
      %c0_67 = arith.constant 0 : index
      %202 = vector.load %arg16[%c0_66, %c0_67] : memref<1x32xf32, #tpu.memory_space<vmem>>, vector<1x32xf32>
      %c0_68 = arith.constant 0 : index
      %c0_69 = arith.constant 0 : index
      %203 = vector.load %arg17[%c0_68, %c0_69] : memref<1x32xf32, #tpu.memory_space<vmem>>, vector<1x32xf32>
      %cst_70 = arith.constant dense<0.000000e+00> : vector<16xf32>
      %204 = vector.multi_reduction <add>, %197, %cst_70 [1] : vector<16x32xf32> to vector<16xf32>
      %205 = vector.shape_cast %204 : vector<16xf32> to vector<16x1xf32>
      %cst_71 = arith.constant 3.200000e+01 : f32
      %206 = vector.broadcast %cst_71 : f32 to vector<16x1xf32>
      %207 = arith.divf %205, %206 : vector<16x1xf32>
      %208 = vector.broadcast %207 : vector<16x1xf32> to vector<16x32xf32>
      %209 = arith.subf %197, %208 : vector<16x32xf32>
      %210 = arith.mulf %209, %209 : vector<16x32xf32>
      %cst_72 = arith.constant dense<0.000000e+00> : vector<16xf32>
      %211 = vector.multi_reduction <add>, %210, %cst_72 [1] : vector<16x32xf32> to vector<16xf32>
      %212 = vector.shape_cast %211 : vector<16xf32> to vector<16x1xf32>
      %cst_73 = arith.constant 3.200000e+01 : f32
      %213 = vector.broadcast %cst_73 : f32 to vector<16x1xf32>
      %214 = arith.divf %212, %213 : vector<16x1xf32>
      %215 = vector.broadcast %207 : vector<16x1xf32> to vector<16x32xf32>
      %216 = arith.subf %197, %215 : vector<16x32xf32>
      %cst_74 = arith.constant 9.99999974E-6 : f32
      %217 = vector.broadcast %cst_74 : f32 to vector<16x1xf32>
      %218 = arith.addf %214, %217 : vector<16x1xf32>
      %219 = math.rsqrt %218 : vector<16x1xf32>
      %220 = vector.broadcast %219 : vector<16x1xf32> to vector<16x32xf32>
      %221 = arith.mulf %216, %220 : vector<16x32xf32>
      %222 = vector.broadcast %202 : vector<1x32xf32> to vector<16x32xf32>
      %223 = arith.mulf %221, %222 : vector<16x32xf32>
      %224 = vector.broadcast %203 : vector<1x32xf32> to vector<16x32xf32>
      %225 = arith.addf %223, %224 : vector<16x32xf32>
      %c0_75 = arith.constant 0 : index
      %c0_76 = arith.constant 0 : index
      %226 = vector.load %arg18[%c0_75, %c0_76] : memref<16x32xf32, #tpu.memory_space<vmem>>, vector<16x32xf32>
      tpu.vector_store %arg18[%c0_75, %c0_76], %225 {strides = array<i32>} : memref<16x32xf32, #tpu.memory_space<vmem>>, vector<16x32xf32>,
    } else {
    }
    return
  }
  func.func @transform_0(%arg0: i32, %arg1: i32) -> (i32, i32) {
    %c0_i32 = arith.constant 0 : i32
    %c0_i32_0 = arith.constant 0 : i32
    return %arg0, %c0_i32 : i32, i32
  }
  func.func @transform_1(%arg0: i32, %arg1: i32) -> (i32, i32, i32) {
    %c0_i32 = arith.constant 0 : i32
    %c0_i32_0 = arith.constant 0 : i32
    %c0_i32_1 = arith.constant 0 : i32
    return %arg0, %c0_i32, %c0_i32_0 : i32, i32, i32
  }
  func.func @transform_2(%arg0: i32, %arg1: i32) -> (i32, i32, i32) {
    %c0_i32 = arith.constant 0 : i32
    %c0_i32_0 = arith.constant 0 : i32
    %c0_i32_1 = arith.constant 0 : i32
    return %arg1, %c0_i32, %c0_i32_0 : i32, i32, i32
  }
  func.func @transform_3(%arg0: i32, %arg1: i32) -> (i32, i32, i32) {
    %c0_i32 = arith.constant 0 : i32
    %c0_i32_0 = arith.constant 0 : i32
    %c0_i32_1 = arith.constant 0 : i32
    return %arg1, %c0_i32, %c0_i32_0 : i32, i32, i32
  }
  func.func @transform_4(%arg0: i32, %arg1: i32) -> (i32, i32, i32) {
    %c0_i32 = arith.constant 0 : i32
    %c0_i32_0 = arith.constant 0 : i32
    %c0_i32_1 = arith.constant 0 : i32
    return %arg1, %c0_i32, %c0_i32_0 : i32, i32, i32
  }
  func.func @transform_5(%arg0: i32, %arg1: i32) -> (i32, i32, i32) {
    %c0_i32 = arith.constant 0 : i32
    %c0_i32_0 = arith.constant 0 : i32
    %c0_i32_1 = arith.constant 0 : i32
    return %arg1, %c0_i32, %c0_i32_0 : i32, i32, i32
  }
  func.func @transform_6(%arg0: i32, %arg1: i32) -> (i32, i32, i32) {
    %c0_i32 = arith.constant 0 : i32
    %c0_i32_0 = arith.constant 0 : i32
    %c0_i32_1 = arith.constant 0 : i32
    return %arg1, %c0_i32, %c0_i32_0 : i32, i32, i32
  }
  func.func @transform_7(%arg0: i32, %arg1: i32) -> (i32, i32, i32) {
    %c0_i32 = arith.constant 0 : i32
    %c0_i32_0 = arith.constant 0 : i32
    %c0_i32_1 = arith.constant 0 : i32
    return %arg1, %c0_i32, %c0_i32_0 : i32, i32, i32
  }
  func.func @transform_8(%arg0: i32, %arg1: i32) -> (i32, i32, i32) {
    %c0_i32 = arith.constant 0 : i32
    %c0_i32_0 = arith.constant 0 : i32
    %c0_i32_1 = arith.constant 0 : i32
    return %arg1, %c0_i32, %c0_i32_0 : i32, i32, i32
  }
  func.func @transform_9(%arg0: i32, %arg1: i32) -> (i32, i32, i32) {
    %c0_i32 = arith.constant 0 : i32
    %c0_i32_0 = arith.constant 0 : i32
    %c0_i32_1 = arith.constant 0 : i32
    return %arg1, %c0_i32, %c0_i32_0 : i32, i32, i32
  }
  func.func @transform_10(%arg0: i32, %arg1: i32) -> (i32, i32, i32) {
    %c0_i32 = arith.constant 0 : i32
    %c0_i32_0 = arith.constant 0 : i32
    %c0_i32_1 = arith.constant 0 : i32
    return %arg1, %c0_i32, %c0_i32_0 : i32, i32, i32
  }
  func.func @transform_11(%arg0: i32, %arg1: i32) -> (i32, i32, i32) {
    %c0_i32 = arith.constant 0 : i32
    %c0_i32_0 = arith.constant 0 : i32
    %c0_i32_1 = arith.constant 0 : i32
    return %arg1, %c0_i32, %c0_i32_0 : i32, i32, i32
  }
  func.func @transform_12(%arg0: i32, %arg1: i32) -> (i32, i32, i32) {
    %c0_i32 = arith.constant 0 : i32
    %c0_i32_0 = arith.constant 0 : i32
    %c0_i32_1 = arith.constant 0 : i32
    return %arg1, %c0_i32, %c0_i32_0 : i32, i32, i32
  }
  func.func @transform_13(%arg0: i32, %arg1: i32) -> (i32, i32, i32) {
    %c0_i32 = arith.constant 0 : i32
    %c0_i32_0 = arith.constant 0 : i32
    %c0_i32_1 = arith.constant 0 : i32
    return %arg1, %c0_i32, %c0_i32_0 : i32, i32, i32
  }
  func.func @transform_14(%arg0: i32, %arg1: i32) -> (i32, i32) {
    %c0_i32 = arith.constant 0 : i32
    %c0_i32_0 = arith.constant 0 : i32
    %c0_i32_1 = arith.constant 0 : i32
    return %c0_i32, %c0_i32_0 : i32, i32
  }
  func.func @transform_15(%arg0: i32, %arg1: i32) -> (i32, i32) {
    %c0_i32 = arith.constant 0 : i32
    %c0_i32_0 = arith.constant 0 : i32
    %c0_i32_1 = arith.constant 0 : i32
    return %c0_i32, %c0_i32_0 : i32, i32
  }
  func.func @transform_16(%arg0: i32, %arg1: i32) -> (i32, i32) {
    %c0_i32 = arith.constant 0 : i32
    %c0_i32_0 = arith.constant 0 : i32
    return %arg0, %c0_i32 : i32, i32
  }
}

</mosaic_0001>

<bundles_post_ra>
// kernel: tpu_custom_call.1
= control target key start
LH: loop header
LB: loop body
LE: loop exit
PB: predicated region body
PF: predicated region fallthrough
CT: control target
= control target key end

     0   :  { %s2943_s0 = inlined_call_operand.hbm [shape: f32[16,32], index: 0, kind: input, shape index: {}]   ;;  %s2944_s1 = inlined_call_operand.hbm [shape: f32[1,2,8], index: 1, kind: input, shape index: {}]   ;;  %s2945_s2 = inlined_call_operand.vmem [shape: f32[2,32,96], index: 2, kind: input, shape index: {}]   ;;  %s2946_s3 = inlined_call_operand.vmem [shape: f32[2,1,96], index: 3, kind: input, shape index: {}]   ;;  %s2947_s4 = inlined_call_operand.vmem [shape: f32[2,32,32], index: 4, kind: input, shape index: {}]   ;;  %s2948_s5 = inlined_call_operand.hbm [shape: f32[2,1,32], index: 5, kind: input, shape index: {}]   ;;  %s2949_s6 = inlined_call_operand.vmem [shape: f32[2,1,32], index: 6, kind: input, shape index: {}]   ;;  %s2950_s7 = inlined_call_operand.hbm [shape: f32[2,1,32], index: 7, kind: input, shape index: {}]   ;;  %s2951_s8 = inlined_call_operand.vmem [shape: f32[2,32,64], index: 8, kind: input, shape index: {}]   ;;  %s2952_s9 = inlined_call_operand.vmem [shape: f32[2,1,64], index: 9, kind: input, shape index: {}]   ;;  %s2953_s10 = inlined_call_operand.vmem [shape: f32[2,64,32], index: 10, kind: input, shape index: {}]   ;;  %s2954_s11 = inlined_call_operand.vmem [shape: f32[2,1,32], index: 11, kind: input, shape index: {}]   ;;  %s2955_s12 = inlined_call_operand.vmem [shape: f32[2,1,32], index: 12, kind: input, shape index: {}]   ;;  %s2956_s13 = inlined_call_operand.hbm [shape: f32[2,1,32], index: 13, kind: input, shape index: {}]   ;;  %s2957_s14 = inlined_call_operand.vmem [shape: f32[1,32], index: 14, kind: input, shape index: {}]   ;;  %s2958_s15 = inlined_call_operand.vmem [shape: f32[1,32], index: 15, kind: input, shape index: {}]   ;;  %s2959_s16 = inlined_call_operand.hbm [shape: f32[16,32], index: 16, kind: output, shape index: {}]  }
   0x1   :  { %2963 = sst [smem:[#allocation20_spill]] %s2943_s0 }
   0x2   :  { %2964 = sst [smem:[#allocation21_spill]] %s2944_s1 }
   0x3   :  { %2965 = sst [smem:[#allocation22_spill]] %s2945_s2 }
   0x4   :  { %2966 = sst [smem:[#allocation23_spill]] %s2947_s4 }
   0x5   :  { %2967 = sst [smem:[#allocation24_spill]] %s2948_s5 }
   0x6   :  { %2968 = sst [smem:[#allocation25_spill]] %s2950_s7 }
   0x7   :  { %2969 = sst [smem:[#allocation26_spill]] %s2951_s8 }
   0x8   :  { %2970 = sst [smem:[#allocation27_spill]] %s2952_s9 }
   0x9   :  { %2971 = sst [smem:[#allocation28_spill]] %s2953_s10 }
   0xa   :  { %2972 = sst [smem:[#allocation29_spill]] %s2954_s11 }
   0xb   :  { %2973 = sst [smem:[#allocation30_spill]] %s2955_s12 }
   0xc   :  { %2974 = sst [smem:[#allocation31_spill]] %s2956_s13 }
   0xd   :  { %2975 = sst [smem:[#allocation32_spill]] %s2957_s14 }
   0xe   :  { %2976 = sst [smem:[#allocation33_spill]] %s2958_s15 }
   0xf   :  { %2977 = sst [smem:[#allocation34_spill]] %s2959_s16 }
  0x10   :  { %21 = vsyncpa [#allocation4], 0 }
  0x11   :  { %22 = vsyncpa [#allocation7], 0 }
  0x12   :  { %23 = vsyncpa [#allocation5], 0  ;;  %s2502_s21 = smov 0   ;;  %s2504_s22 = smov 0  }
  0x13   :  { %s2506_s23 = smov 0   ;;  %s2508_s24 = smov 0  }
  0x14   :  { %s2510_s25 = smov 0   ;;  %s2512_s26 = smov 0  }
  0x15 LB: > { %2978 = sst [smem:[#allocation16_spill]] %s2388_s23  ;;  %s2531_s27 = sadd.s32 4294967295, %s2400_s26   ;;  %s2400_s26 = sphi %s2512_s26, %s29_s26   ;;  %s2396_s25 = sphi %s2510_s25, %s3011_s25   ;;  %s2392_s24 = sphi %s2508_s24, %s3010_s24   ;;  %s2388_s23 = sphi %s2506_s23, %s3009_s23   ;;  %s2384_s22 = sphi %s2504_s22, %s3013_s22   ;;  %s2380_s21 = sphi %s2502_s21, %s3012_s21  }
  0x16   : > { %2979 = sst [smem:[#allocation17_spill]] %s2396_s25  ;;  %p191_p0 = scmp.ne.s32.totalorder %s2384_s22, %s2380_s21 }
  0x17   : > { %p192_p1 = scmp.eq.s32.totalorder %s2531_s27, 0  ;;  %p1932_p2 = scmp.ge.s32.totalorder %s2400_s26, 1 }
  0x18   : > { %p478_p3 = scmp.lt.s32.totalorder %s2400_s26, 3  ;;  %s2981_s0 = sld [smem:[#allocation20_spill]] }
  0x19   : > { %p2539_p4 = por %p192_p1, %p191_p0  ;;  %s2402_s19 = smov [#allocation3]  }
  0x1a   : > { %p2546_p5 = pnand %p1932_p2, %p478_p3  ;;  %s494_s20 = sshll.u32 %s2402_s19, 4  ;;  %s495_s20 = int_to_ptr.vmem [resolvable:$true] %s494_s20 }
  0x1b   : > { %s2403_s29 = smov 128   ;;  %s2404_s30 = smov 8  }
  0x1c   : > { %p2007_p6 = pneg %p2546_p5  ;;  %s178_s16 = sadd.s32 1, %s2388_s23 }
  0x1d   : > { %p185_p9 = scmp.ne.s32.totalorder %s2388_s23, %s2384_s22  ;;  %p186_p10 = scmp.eq.s32.totalorder %s2400_s26, 0 }
  0x1e   : > { %s492_s17 = sshll.u32 %s2981_s0, 4  ;;  %p2554_p7 = pnand %p2007_p6, %p192_p1  ;;  %s493_s17 = int_to_ptr.hbm [resolvable:$true] %s492_s17 }
  0x1f   : > { %s38_s0 = sadd.s32 1, %s2396_s25  ;;  %p2567_p11 = por %p186_p10, %p185_p9 }
  0x20   : > { %2010 = dma.hbm_to_vmem [thread:$0]  (!%p2554_p7), %s493_s17, 256, %s495_s20, [#allocation4], %s2403_s29, %s2403_s29, %s2404_s30  }
  0x21   : > { %p39_p8 = scmp.ge.s32.totalorder %s38_s0, 2  ;;  %p2026_p12 = scmp.lt.s32.totalorder %s2400_s26, 2 }
  0x22   : > { %s550_s14 = sand.u32 1, %s2400_s26   ;;  %s552_s12 = sand.u32 1, %s2388_s23  }
  0x23   : > { %s3015_s0 = smov (%p39_p8, %s38_s0), 0  ;;  %s2986_s5 = sld [smem:[#allocation24_spill]] }
  0x24   : > { %2984 = sst [smem:[#allocation18_spill]] %s3015_s0  ;;  %s175_s15 = ssub.s32 %s2396_s25, %s3015_s0 }
  0x25   : > { %p176_p13 = scmp.eq.s32.totalorder %s175_s15, 0  ;;  %s553_s10 = scalar_lea.vmem [#allocation8], %s552_s12 }
  0x26   : > { %s560_s9 = sshll.u32 %s553_s10, 4  ;;  %p2585_p0 = pnand %p2026_p12, %p2567_p11  ;;  %s561_s9 = int_to_ptr.vmem [resolvable:$true] %s560_s9 }
  0x27   : > { %s2581_s30 = scalar_select %p176_p13, %s2388_s23, %s178_s16  }
  0x28   : > { %s2989_s7 = sld [smem:[#allocation25_spill]]  ;;  %s551_s20 = scalar_lea.sflag [#allocation4], %s550_s14 }
  0x29   : > { %s556_s29 = scalar_lea.hbm %s2986_s5, %s2396_s25  ;;  %2987 = sst [smem:[#allocation19_spill]] %s2581_s30 }
  0x2a   : > { %s558_s11 = sshll.u32 %s556_s29, 4  ;;  %s576_s10 = scalar_lea.vmem [#allocation9], %s552_s12  ;;  %s559_s11 = int_to_ptr.hbm [resolvable:$true] %s558_s11 }
  0x2b   : > { %2017 = dma.hbm_to_vmem [thread:$0]  (!%p2585_p0), %s559_s11, 16, %s561_s9, %s551_s20  }
  0x2c   : > { %s583_s19 = sshll.u32 %s576_s10, 4  ;;  %s2990_s1 = sld [smem:[#allocation21_spill]]  ;;  %s584_s19 = int_to_ptr.vmem [resolvable:$true] %s583_s19 }
  0x2d   : > { %s2405_s0 = smov [#allocation6]   ;;  %s2991_s13 = sld [smem:[#allocation31_spill]] }
  0x2e   : > { %s579_s17 = scalar_lea.hbm %s2989_s7, %s2396_s25  ;;  %s511_s15 = sshll.u32 %s2405_s0, 4  ;;  %s512_s15 = int_to_ptr.vmem [resolvable:$true] %s511_s15 }
  0x2f   : > { %s581_s16 = sshll.u32 %s579_s17, 4  ;;  %s627_s11 = scalar_lea.vmem [#allocation10], %s552_s12  ;;  %s582_s16 = int_to_ptr.hbm [resolvable:$true] %s581_s16 }
  0x30   : > { %2020 = dma.hbm_to_vmem [thread:$0]  (!%p2585_p0), %s582_s16, 16, %s584_s19, %s551_s20  }
  0x31   : > { %s634_s10 = sshll.u32 %s627_s11, 4  ;;  %s635_s10 = int_to_ptr.vmem [resolvable:$true] %s634_s10 }
  0x32   : > { %s509_s30 = sshll.u32 %s2990_s1, 4  ;;  %643 = sbr.rel (%p2546_p5) target bundleno = 2800 (0xaf0), region = 84  ;;  %s510_s30 = int_to_ptr.hbm [resolvable:$true] %s509_s30 }
  0x33   : > { %s630_s14 = scalar_lea.hbm %s2991_s13, %s2396_s25 }
  0x34   : > { %2013 = dma.hbm_to_vmem [thread:$0]  (!%p2554_p7), %s510_s30, 32, %s512_s15, [#allocation7]  }
  0x35   : > { %s632_s9 = sshll.u32 %s630_s14, 4  ;;  %s633_s9 = int_to_ptr.hbm [resolvable:$true] %s632_s9 }
  0x36   : > { %2023 = dma.hbm_to_vmem [thread:$0]  (!%p2585_p0), %s633_s9, 16, %s635_s10, %s551_s20  }
  0x37   : > { %2363 = dma.done.wait (%p192_p1), [#allocation4], 256  }
  0x38   : > { %2365 = vsyncadd (%p192_p1), [#allocation4], 4294967040 }
  0x39   : > { %2367 = dma.done.wait (%p192_p1), [#allocation7], 32  }
  0x3a   : > { %2369 = vsyncadd (%p192_p1), [#allocation7], 4294967264  ;;  %s655_s5 = sand.u32 1, %s2531_s27   ;;  %s2620_s7 = sand.u32 1, %s2384_s22  }
  0x3b   : > { %s656_s8 = scalar_lea.sflag [#allocation4], %s655_s5 }
  0x3c   : > { %2371 = dma.done.wait (%p2539_p4), %s656_s8, 48  }
  0x3d   : > { %2373 = vsyncadd (%p2539_p4), %s656_s8, 4294967248  ;;  %p764_p2 = scmp.lt.s32.totalorder %s2392_s24, 1  ;;  %s2992_s2 = sld [smem:[#allocation22_spill]] }
  0x3e   : > { %s2993_s4 = sld [smem:[#allocation23_spill]]  ;;  %s676_s5 = scalar_lea.vmem [#allocation10], %s2620_s7 }
  0x3f   : > { %s2629_s18 = scalar_select %p764_p2, %s2392_s24, 1 }
  0x40   : > { %s2994_s8 = sld [smem:[#allocation26_spill]]  ;;  %p1947_p1 = scmp.ne.s32.totalorder %s2392_s24, 0 }
  0x41   : > { %s1985_s21 = sshll.u32 %s2629_s18, 5  ;;  %s2995_s28 = sld [smem:[#allocation27_spill]] }
  0x42   : > { %s1988_s19 = sshll.u32 %s2629_s18, 6  ;;  %s2996_s13 = sld [smem:[#allocation28_spill]] }
  0x43   : > { %s2639_s29 = scalar_lea.vmem %s2992_s2, %s1985_s21  ;;  %s2997_s25 = sld [smem:[#allocation29_spill]] }
  0x44   : > { %s2644_s17 = scalar_lea.vmem %s2993_s4, %s1985_s21  ;;  %s2998_s23 = sld [smem:[#allocation30_spill]] }
  0x46   : > { %s2653_s12 = scalar_lea.vmem %s2994_s8, %s1985_s21  ;;  %s667_s21 = scalar_lea.vmem [#allocation9], %s2620_s7 }
  0x47   : > { %s787_s20 = scalar_lea.vmem %s2995_s28, %s2629_s18  ;;  %803 = sbr.rel (%p1947_p1) target bundleno = 79 (0x4f), region = 108 }
  0x48   : > { %s2663_s0 = scalar_lea.vmem %s2996_s13, %s1988_s19 }
  0x49   : > { %s795_s14 = scalar_lea.vmem %s2997_s25, %s2629_s18 }
  0x4a   : > { %s798_s10 = scalar_lea.vmem %s2998_s23, %s2629_s18 }
  0x4c   : > { %v804_v0 = vld [vmem:[#allocation3] sm:$0xff]  ;;  %vm806_vm0 = vcmask 261120   ;;  %v805_v1 = vld [vmem:[#allocation3 + $0x8] sm:$0xff] }
  0x4d   : > { %807 = vst.msk [vmem:[#allocation2] sm:$0xff] %vm806_vm0, %v804_v0 }
  0x4e   : > { %808 = vst.msk [vmem:[#allocation2 + $0x8] sm:$0xff] %vm806_vm0, %v805_v1 }
  0x4f PF: > { %vm814_vm1 = vcmask 261120   ;;  %v2406_v4 = vmov 32.0   ;;  %v879_v16 = vld [vmem:[%s2639_s29 + $0x18] sm:$0xff]  ;;  %v878_v17 = vld [vmem:[%s2639_s29 + $0x10] sm:$0xff]  ;;  %v877_v18 = vld [vmem:[%s2639_s29 + $0x8] sm:$0xff]  ;;  %s2999_s4 = scalar_lea.vmem %s2949_s6, %s2629_s18  ;;  %s3000_s25 = scalar_lea.vmem %s2946_s3, %s2629_s18  ;;  %vm923_vm6 = vcmask 64512  }
  0x50   : > { %2112 = vrcp.f32 %v2406_v4  ;;  %902 = vmatpush.msra.mxu0 %v879_v16  ;;  %v876_v19 = vld [vmem:[%s2639_s29] sm:$0xff]  ;;  %s2407_s28 = smov 120   ;;  %s2408_s29 = smov 112   ;;  %vm1187_vm10 = vcmask 130048   ;;  %vm1189_vm11 = vcmask 195584   ;;  %vm1610_vm15 = vcmask 523264  }
  0x51   : > { %v2699_v31 = vld [vmem:[%s2999_s4] ss:$0 sm:$0xff]  ;;  %s2409_s11 = smov 104   ;;  %s2410_s8 = smov 96  }
  0x52   : > { %903 = vmatpush.msra.mxu0 %v878_v17  ;;  %v2105_v34 = vld [vmem:[%s667_s21] ss:$0 sm:$0xff]  ;;  %s2411_s30 = smov 64   ;;  %s2412_s16 = smov 16  }
  0x53   : > { %v2710_v37 = vld [vmem:[%s3000_s25] ss:$0 sm:$0xff]  ;;  %s2413_s19 = smov 8   ;;  %s2414_s15 = smov 24  }
  0x54   : > { %v2676_v2 = vld [vmem:[#allocation2] sm:$0xff]  ;;  %904 = vmatpush.msra.mxu0 %v877_v18  ;;  %p1980_p3 = scmp.ne.s32.totalorder %s2392_s24, 1 }
  0x55   : > { %v815_v3 = vsel %vm814_vm1, %v2676_v2, 0.0  ;;  %v2689_v20 = vld [vmem:[#allocation2 + $0x8] sm:$0xff]  ;;  %v2743_v51 = vld [vmem:[#allocation6] sm:$0x3]  ;;  %s3006_s13 = sld [smem:[#allocation33_spill]] (!%p1980_p3) }
  0x56   : > { %816 = vadd.xlane.f32.xlu0 %v815_v3  ;;  %v2113_v5 = vpop.eup %2112  ;;  %905 = vmatpush.msra.mxu0 %v876_v19  ;;  %v818_v21 = vsel %vm814_vm1, %v2689_v20, 0.0  ;;  %v920_v53 = vperm.slane %v2743_v51, 0 }
  0x57   : > { %v822_v6 = vmul.f32 32.0, %v2113_v5  ;;  %vm826_vm2 = vweird.f32 %v2113_v5  ;;  %819 = vadd.xlane.f32.xlu1 %v818_v21 }
  0x59   : > { %v823_v7 = vsub.f32 1.0, %v822_v6 }
  0x5b   : > { %v824_v8 = vmul.f32 %v2113_v5, %v823_v7 }
  0x5d   : > { %v825_v9 = vadd.f32 %v2113_v5, %v824_v8 }
  0x5f   : > { %v2680_v10 = vsel %vm826_vm2, %v2113_v5, %v825_v9 }
  0xc9   : > { %v817_v11 = vpop.xlane.xlu0 %816 }
  0xca   : > { %v828_v12 = vmul.f32 %v2680_v10, %v817_v11  ;;  %v820_v42 = vpop.xlane.xlu1 %819 }
  0xcb   : > { %v829_v45 = vmul.f32 %v2680_v10, %v820_v42 }
  0xcc   : > { %v830_v13 = vsub.f32 %v2676_v2, %v828_v12 }
  0xcd   : > { %v831_v46 = vsub.f32 %v2689_v20, %v829_v45 }
  0xce   : > { %v832_v14 = vmul.f32 %v830_v13, %v830_v13 }
  0xcf   : > { %v833_v47 = vmul.f32 %v831_v46, %v831_v46 }
  0xd0   : > { %v834_v15 = vsel %vm814_vm1, %v832_v14, 0.0 }
  0xd1   : > { %835 = vadd.xlane.f32.xlu0 %v834_v15  ;;  %v837_v48 = vsel %vm814_vm1, %v833_v47, 0.0 }
 0x144   : > { %v836_v22 = vpop.xlane.xlu0 %835 }
 0x145   : > { %v840_v23 = vmul.f32 %v836_v22, %v2680_v10 }
 0x147   : > { %v842_v24 = vadd.f32 1e-05, %v840_v23 }
 0x149   : > { %2114 = vrsqrt.f32 %v842_v24  ;;  %vm850_vm4 = vweird.f32 %v842_v24 }
 0x14f   : > { %v2115_v25 = vpop.eup %2114 }
 0x150   : > { %v845_v26 = vmul.f32 %v2115_v25, %v842_v24  ;;  %vm851_vm3 = vweird.f32 %v2115_v25 }
 0x151   : > { %vm852_vm5 = vmor %vm850_vm4, %vm851_vm3 }
 0x152   : > { %v846_v27 = vmul.f32 %v2115_v25, %v845_v26 }
 0x154   : > { %v847_v28 = vmul.f32 0.5, %v846_v27 }
 0x156   : > { %v848_v29 = vsub.f32 1.5, %v847_v28 }
 0x158   : > { %v849_v30 = vmul.f32 %v2115_v25, %v848_v29 }
 0x15a   : > { %v853_v32 = vsel %vm852_vm5, %v2115_v25, %v849_v30 }
 0x15b   : > { %v864_v33 = vmul.f32 %v853_v32, %v830_v13 }
 0x15d   : > { %v869_v35 = vmul.f32 %v2699_v31, %v864_v33 }
 0x15f   : > { %v874_v36 = vadd.f32 %v2105_v34, %v869_v35 }
 0x161   : > { %1948 = vmatmul.msk.f32.vlgmr.msra.gmra.mxu0 %vm814_vm1, %v874_v36 }
 0x1de   : > { %v907_v38 = vpop.f32.mrf.mxu0 }
 0x1df   : > { %v2713_v39 = vadd.f32 %v2710_v37, %v907_v38 }
 0x1e1   : > { %914 = vrot.lane.b32.xlu0 %v2713_v39, %s2407_s28  ;;  %916 = vrot.lane.b32.xlu2 %v2713_v39, %s2408_s29 }
 0x1e2   : > { %918 = vrot.lane.b32.xlu1 %v2713_v39, %s2409_s11 }
 0x1e9   : > { %921 = vrot.lane.b32.xlu2 %v2713_v39, %s2410_s8 }
 0x23b   : > { %v2723_v40 = vpop.permute.xlu2 %916 }
 0x23c   : > { %974 = vrot.lane.b32.xlu1 %v2723_v40, %s2410_s8 }
 0x243   : > { %v922_v41 = vpop.permute.xlu2 %921 }
 0x244   : > { %1950 = vmatpush.xpose.msk.msra.mxu2 %vm923_vm6, %v922_v41 }
 0x247   : > { %1951 = vmatmul.msk.f32.vlgmr.msra.gmra.mxu2 %vm923_vm6, %v2713_v39 }
 0x253   : > { %v2730_v43 = vpop.permute.xlu0 %914 }
 0x254   : > { %v919_v44 = vpop.permute.xlu1 %918  ;;  %948 = vrot.lane.b32.xlu0 %v2730_v43, %s2410_s8 }
 0x255   : > { %1000 = vrot.lane.b32.xlu2 %v919_v44, %s2410_s8  ;;  %v2094_v13 = vpack.i.bf16 %v919_v44, %v2713_v39 }
 0x27e   : > { %838 = vadd.xlane.f32.xlu2 %v837_v48 }
 0x2ae   : > { %v975_v49 = vpop.permute.xlu1 %974 }
 0x2af   : > { %v1001_v50 = vpop.permute.xlu2 %1000  ;;  %1954 = vmatpush.xpose.msk.msra.mxu3 %vm923_vm6, %v975_v49 }
 0x2b0   : > { %1956 = vmatpush.xpose.msk.msra.mxu1 %vm923_vm6, %v1001_v50 }
 0x2b2   : > { %1955 = vmatmul.msk.f32.vlgmr.msra.gmra.mxu3 %vm923_vm6, %v2723_v40 }
 0x2b3   : > { %1957 = vmatmul.msk.f32.vlgmr.msra.gmra.mxu1 %vm923_vm6, %v919_v44 }
 0x2c6   : > { %v949_v52 = vpop.permute.xlu0 %948 }
 0x2c7   : > { %1952 = vmatpush.xpose.msk.msrb.mxu2 %vm923_vm6, %v949_v52 }
 0x2ca   : > { %v945_v54 = vpop.f32.mrf.mxu2  ;;  %1953 = vmatmul.msk.f32.vlgmr.msrb.gmra.mxu2 %vm923_vm6, %v2730_v43 }
 0x2cb   : > { %v946_v55 = vadd.f32 %v945_v54, %v920_v53 }
 0x2cd   : > { %v1026_v56 = vsel %vm923_vm6, %v946_v55, -inf }
 0x2ce   : > { %1027 = vmax.xlane.f32.xlu1 %v1026_v56 }
 0x2f1   : > { %v839_v57 = vpop.xlane.xlu2 %838 }
 0x2f2   : > { %v841_v58 = vmul.f32 %v839_v57, %v2680_v10 }
 0x2f4   : > { %v843_v59 = vadd.f32 1e-05, %v841_v58 }
 0x2f6   : > { %2116 = vrsqrt.f32 %v843_v59  ;;  %vm860_vm8 = vweird.f32 %v843_v59 }
 0x2fc   : > { %v2117_v60 = vpop.eup %2116 }
 0x2fd   : > { %v855_v61 = vmul.f32 %v2117_v60, %v843_v59  ;;  %vm861_vm7 = vweird.f32 %v2117_v60 }
 0x2fe   : > { %vm862_vm9 = vmor %vm860_vm8, %vm861_vm7 }
 0x2ff   : > { %v856_v62 = vmul.f32 %v2117_v60, %v855_v61 }
 0x301   : > { %v857_v63 = vmul.f32 0.5, %v856_v62 }
 0x303   : > { %v858_v0 = vsub.f32 1.5, %v857_v63 }
 0x305   : > { %v859_v1 = vmul.f32 %v2117_v60, %v858_v0 }
 0x307   : > { %v863_v3 = vsel %vm862_vm9, %v2117_v60, %v859_v1 }
 0x308   : > { %v865_v4 = vmul.f32 %v863_v3, %v831_v46  ;;  %v1198_v3 = vperm.slane %v2743_v51, 1 }
 0x30a   : > { %v870_v5 = vmul.f32 %v2699_v31, %v865_v4 }
 0x30c   : > { %v875_v6 = vadd.f32 %v2105_v34, %v870_v5 }
 0x30e   : > { %1949 = vmatmul.msk.f32.gmra.mxu0 %vm814_vm1, %v875_v6 }
 0x330   : > { %v1023_v7 = vpop.f32.mrf.mxu1 }
 0x331   : > { %v1024_v8 = vadd.f32 %v1023_v7, %v920_v53 }
 0x333   : > { %v1035_v9 = vsel %vm923_vm6, %v1024_v8, -inf }
 0x334   : > { %1036 = vmax.xlane.f32.xlu0 %v1035_v9 }
 0x335   : > { %v997_v17 = vpop.f32.mrf.mxu3 }
 0x336   : > { %v998_v18 = vadd.f32 %v997_v17, %v920_v53 }
 0x338   : > { %v1032_v21 = vsel %vm923_vm6, %v998_v18, -inf }
 0x341   : > { %v1028_v27 = vpop.xlane.xlu1 %1027 }
 0x342   : > { %v1038_v29 = vsub.f32 %v946_v55, %v1028_v27 }
 0x344   : > { %v1042_v30 = vmul.f32 1.442695, %v1038_v29 }
 0x34d   : > { %v971_v23 = vpop.f32.mrf.mxu2 }
 0x34e   : > { %v972_v24 = vadd.f32 %v971_v23, %v920_v53 }
 0x350   : > { %v1029_v25 = vsel %vm923_vm6, %v972_v24, -inf }
 0x38b   : > { %v910_v11 = vpop.f32.mrf.mxu0 }
 0x38c   : > { %v2755_v12 = vadd.f32 %v2710_v37, %v910_v11 }
 0x38e   : > { %1194 = vrot.lane.b32.xlu1 %v2755_v12, %s2408_s29  ;;  %1192 = vrot.lane.b32.xlu0 %v2755_v12, %s2407_s28 }
 0x38f   : > { %1196 = vrot.lane.b32.xlu2 %v2755_v12, %s2409_s11 }
 0x396   : > { %2095 = vrot.lane.b32.xlu1 %v2094_v13, %s2411_s30 }
 0x3a7   : > { %v1037_v14 = vpop.xlane.xlu0 %1036 }
 0x3a8   : > { %v1041_v15 = vsub.f32 %v1024_v8, %v1037_v14 }
 0x3aa   : > { %v1048_v16 = vmul.f32 1.442695, %v1041_v15 }
 0x3ac   : > { %2118 = vpow2.f32 %v1048_v16 }
 0x3ad   : > { %2120 = vpow2.f32 %v1042_v30 }
 0x3b2   : > { %v2119_v19 = vpop.eup %2118 }
 0x3b3   : > { %v1059_v22 = vsel %vm923_vm6, %v2119_v19, 0.0  ;;  %v2121_v34 = vpop.eup %2120 }
 0x3b4   : > { %v1050_v35 = vsel %vm923_vm6, %v2121_v34, 0.0 }
 0x3b8   : > { %1033 = vmax.xlane.f32.xlu2 %v1032_v21  ;;  %1060 = vadd.xlane.f32.xlu0 %v1059_v22 }
 0x3c0   : > { %1030 = vmax.xlane.f32.xlu1 %v1029_v25 }
 0x3cc   : > { %1122 = vrot.lane.b32.xlu0 %v2723_v40, %s2411_s30 }
 0x3e9   : > { %v2770_v26 = vpop.permute.xlu2 %1196 }
 0x3ea   : > { %1277 = vrot.lane.b32.xlu2 %v2770_v26, %s2410_s8 }
 0x400   : > { %v2774_v28 = vpop.permute.xlu1 %1194  ;;  %v2777_v36 = vpop.permute.xlu0 %1192 }
 0x408   : > { %v2096_v31 = vpop.permute.xlu1 %2095 }
 0x409   : > { %v2098_v32 = vunpack.i.h.bf16 %v2096_v31  ;;  %v2097_v33 = vunpack.i.l.bf16 %v2096_v31 }
 0x40b   : > { %1091 = vmatpush.msra.mxu2 %v2097_v33 }
 0x40d   : > { %1169 = vmatpush.msrb.mxu2 %v2098_v32 }
 0x413   : > { %1051 = vadd.xlane.f32.xlu2 %v1050_v35 }
 0x42b   : > { %1225 = vrot.lane.b32.xlu2 %v2777_v36, %s2410_s8  ;;  %v1034_v37 = vpop.xlane.xlu2 %1033  ;;  %v1061_v44 = vpop.xlane.xlu0 %1060 }
 0x42c   : > { %v1040_v38 = vsub.f32 %v998_v18, %v1034_v37 }
 0x42e   : > { %v1046_v39 = vmul.f32 1.442695, %v1040_v38 }
 0x430   : > { %2122 = vpow2.f32 %v1046_v39 }
 0x433   : > { %1096 = vrot.lane.b32.xlu2 %v2730_v43, %s2411_s30  ;;  %v1031_v40 = vpop.xlane.xlu1 %1030 }
 0x434   : > { %v1039_v41 = vsub.f32 %v972_v24, %v1031_v40 }
 0x436   : > { %v2123_v42 = vpop.eup %2122  ;;  %v1044_v45 = vmul.f32 1.442695, %v1039_v41 }
 0x437   : > { %v1056_v46 = vsel %vm923_vm6, %v2123_v42, 0.0 }
 0x438   : > { %2124 = vpow2.f32 %v1044_v45  ;;  %1057 = vadd.xlane.f32.xlu1 %v1056_v46 }
 0x43b   : > { %1199 = vrot.lane.b32.xlu2 %v2755_v12, %s2410_s8 }
 0x43e   : > { %v2125_v47 = vpop.eup %2124  ;;  %v1123_v48 = vpop.permute.xlu0 %1122 }
 0x43f   : > { %1143 = vmatpush.msrb.mxu1 %v1123_v48  ;;  %v1053_v49 = vsel %vm923_vm6, %v2125_v47, 0.0 }
 0x440   : > { %1054 = vadd.xlane.f32.xlu0 %v1053_v49 }
 0x444   : > { %v1278_v43 = vpop.permute.xlu2 %1277 }
 0x451   : > { %1251 = vrot.lane.b32.xlu1 %v2774_v28, %s2410_s8 }
 0x486   : > { %v1052_v50 = vpop.xlane.xlu2 %1051 }
 0x487   : > { %2126 = vrcp.f32 %v1052_v50 }
 0x488   : > { %2128 = vrcp.f32 %v1061_v44 }
 0x48d   : > { %v2127_v52 = vpop.eup %2126 }
 0x48e   : > { %v1066_v53 = vmul.f32 %v2127_v52, %v2121_v34  ;;  %v1226_v54 = vpop.permute.xlu2 %1225  ;;  %v2129_v55 = vpop.eup %2128  ;;  %v2099_v34 = vpack.i.bf16 %v2777_v36, %v2770_v26 }
 0x48f   : > { %1964 = vmatpush.xpose.msk.msrb.mxu0 %vm923_vm6, %v1226_v54  ;;  %v1069_v56 = vmul.f32 %v2129_v55, %v2119_v19 }
 0x490   : > { %1958 = vmatmul.msk.f32.vlgmr.msra.gmra.mxu2 %vm923_vm6, %v1066_v53 }
 0x491   : > { %1968 = vmatpush.xpose.msk.msra.mxu2 %vm923_vm6, %v1278_v43 }
 0x492   : > { %1965 = vmatmul.msk.f32.vlgmr.msrb.gmra.mxu0 %vm923_vm6, %v2777_v36 }
 0x496   : > { %v1097_v57 = vpop.permute.xlu2 %1096 }
 0x497   : > { %1117 = vmatpush.msrb.mxu3 %v1097_v57 }
 0x498   : > { %1961 = vmatmul.msk.f32.vlgmr.msrb.gmra.mxu2 %vm923_vm6, %v1069_v56 }
 0x49e   : > { %v1200_v58 = vpop.permute.xlu2 %1199 }
 0x49f   : > { %1962 = vmatpush.xpose.msk.msra.mxu3 %vm923_vm6, %v1200_v58 }
 0x4a0   : > { %1969 = vmatmul.msk.f32.vlgmr.msra.gmra.mxu2 %vm923_vm6, %v2770_v26 }
 0x4ab   : > { %v1058_v59 = vpop.xlane.xlu1 %1057 }
 0x4ac   : > { %2130 = vrcp.f32 %v1058_v59 }
 0x4b2   : > { %v2131_v60 = vpop.eup %2130 }
 0x4b3   : > { %v1055_v61 = vpop.xlane.xlu0 %1054  ;;  %v1068_v62 = vmul.f32 %v2131_v60, %v2123_v42 }
 0x4b4   : > { %2132 = vrcp.f32 %v1055_v61  ;;  %v1469_v61 = vld [vmem:[%s2644_s17 + $0x18] sm:$0xff] }
 0x4b5   : > { %1960 = vmatmul.msk.f32.vlgmr.msrb.gmra.mxu1 %vm923_vm6, %v1068_v62  ;;  %v1468_v62 = vld [vmem:[%s2644_s17 + $0x10] sm:$0xff] }
 0x4ba   : > { %v2133_v63 = vpop.eup %2132 }
 0x4bb   : > { %v1067_v0 = vmul.f32 %v2133_v63, %v2125_v47  ;;  %v1467_v63 = vld [vmem:[%s2644_s17 + $0x8] sm:$0xff] }
 0x4bd   : > { %1959 = vmatmul.msk.f32.vlgmr.msrb.gmra.mxu3 %vm923_vm6, %v1067_v0 }
 0x4c3   : > { %v1252_v1 = vpop.permute.xlu1 %1251 }
 0x4c4   : > { %1966 = vmatpush.xpose.msk.msra.mxu1 %vm923_vm6, %v1252_v1 }
 0x4c5   : > { %1963 = vmatmul.msk.f32.vlgmr.msra.gmra.mxu3 %vm923_vm6, %v2755_v12 }
 0x4c7   : > { %1967 = vmatmul.msk.f32.vlgmr.msra.gmra.mxu1 %vm923_vm6, %v2774_v28 }
 0x50f   : > { %v1248_v4 = vpop.f32.mrf.mxu0 }
 0x510   : > { %v1249_v5 = vadd.f32 %v1248_v4, %v1198_v3 }
 0x512   : > { %v1306_v6 = vsel %vm923_vm6, %v1249_v5, -inf }
 0x513   : > { %v2807_v7 = vpop.f32.mrf.mxu2  ;;  %1307 = vmax.xlane.f32.xlu1 %v1306_v6 }
 0x51b   : > { %v1171_v8 = vpop.f32.mrf.mxu2 }
 0x523   : > { %v1300_v9 = vpop.f32.mrf.mxu2 }
 0x524   : > { %v1301_v11 = vadd.f32 %v1300_v9, %v1198_v3 }
 0x526   : > { %v1312_v13 = vsel %vm923_vm6, %v1301_v11, -inf }
 0x527   : > { %1313 = vmax.xlane.f32.xlu2 %v1312_v13 }
 0x532   : > { %v1145_v14 = vpop.f32.mrf.mxu1 }
 0x540   : > { %v1119_v15 = vpop.f32.mrf.mxu3 }
 0x544   : > { %v1274_v16 = vpop.f32.mrf.mxu1 }
 0x545   : > { %v1275_v17 = vadd.f32 %v1274_v16, %v1198_v3 }
 0x547   : > { %v1309_v18 = vsel %vm923_vm6, %v1275_v17, -inf }
 0x548   : > { %1310 = vmax.xlane.f32.xlu0 %v1309_v18  ;;  %v1222_v51 = vpop.f32.mrf.mxu3 }
 0x549   : > { %v1223_v19 = vadd.f32 %v1222_v51, %v1198_v3  ;;  %v1466_v3 = vld [vmem:[%s2644_s17] sm:$0xff]  ;;  %s3001_s17 = scalar_lea.vmem [#allocation8], %s2620_s7 }
 0x54a   : > { %v2107_v13 = vld [vmem:[%s3001_s17] ss:$0 sm:$0xff] }
 0x54b   : > { %v1303_v21 = vsel %vm923_vm6, %v1223_v19, -inf }
 0x550   : > { %1304 = vmax.xlane.f32.xlu0 %v1303_v21 }
 0x586   : > { %v1308_v22 = vpop.xlane.xlu1 %1307 }
 0x587   : > { %v1316_v23 = vsub.f32 %v1249_v5, %v1308_v22 }
 0x589   : > { %v1321_v24 = vmul.f32 1.442695, %v1316_v23 }
 0x58b   : > { %2134 = vpow2.f32 %v1321_v24 }
 0x591   : > { %v2135_v25 = vpop.eup %2134 }
 0x592   : > { %v1330_v27 = vsel %vm923_vm6, %v2135_v25, 0.0 }
 0x593   : > { %1331 = vadd.xlane.f32.xlu2 %v1330_v27 }
 0x59a   : > { %v1314_v29 = vpop.xlane.xlu2 %1313 }
 0x59b   : > { %v1318_v30 = vsub.f32 %v1301_v11, %v1314_v29 }
 0x59d   : > { %v1325_v31 = vmul.f32 1.442695, %v1318_v30 }
 0x59f   : > { %2136 = vpow2.f32 %v1325_v31 }
 0x5a5   : > { %v2137_v32 = vpop.eup %2136 }
 0x5a6   : > { %v1336_v33 = vsel %vm923_vm6, %v2137_v32, 0.0 }
 0x5a7   : > { %1337 = vadd.xlane.f32.xlu0 %v1336_v33 }
 0x5ab   : > { %1399 = vrot.lane.b32.xlu2 %v2774_v28, %s2411_s30 }
 0x5b3   : > { %1179 = vrot.lane.b32.xlu2 %v1145_v14, %s2412_s16 }
 0x5bb   : > { %v1311_v35 = vpop.xlane.xlu0 %1310  ;;  %2100 = vrot.lane.b32.xlu0 %v2099_v34, %s2411_s30  ;;  %v1566_v34 = vld [vmem:[%s2653_s12 + $0x18] sm:$0xff] }
 0x5bc   : > { %v1317_v37 = vsub.f32 %v1275_v17, %v1311_v35  ;;  %v1565_v35 = vld [vmem:[%s2653_s12 + $0x10] sm:$0xff] }
 0x5be   : > { %v1323_v38 = vmul.f32 1.442695, %v1317_v37  ;;  %v1564_v37 = vld [vmem:[%s2653_s12 + $0x8] sm:$0xff] }
 0x5c0   : > { %2138 = vpow2.f32 %v1323_v38  ;;  %v1563_v38 = vld [vmem:[%s2653_s12] sm:$0xff] }
 0x5c3   : > { %v1305_v39 = vpop.xlane.xlu0 %1304  ;;  %1175 = vrot.lane.b32.xlu0 %v1119_v15, %s2413_s19 }
 0x5c4   : > { %v1315_v40 = vsub.f32 %v1223_v19, %v1305_v39 }
 0x5c6   : > { %v2139_v41 = vpop.eup %2138  ;;  %v1319_v42 = vmul.f32 1.442695, %v1315_v40 }
 0x5c7   : > { %v1333_v28 = vsel %vm923_vm6, %v2139_v41, 0.0 }
 0x5c8   : > { %2140 = vpow2.f32 %v1319_v42  ;;  %1334 = vadd.xlane.f32.xlu1 %v1333_v28 }
 0x5cb   : > { %1183 = vrot.lane.b32.xlu0 %v1171_v8, %s2414_s15 }
 0x5ce   : > { %v2141_v26 = vpop.eup %2140 }
 0x5cf   : > { %v1327_v36 = vsel %vm923_vm6, %v2141_v26, 0.0 }
 0x5d0   : > { %1328 = vadd.xlane.f32.xlu1 %v1327_v36 }
 0x5e9   : > { %1347 = vrot.lane.b32.xlu1 %v2755_v12, %s2411_s30 }
 0x606   : > { %v1332_v44 = vpop.xlane.xlu2 %1331 }
 0x607   : > { %2142 = vrcp.f32 %v1332_v44 }
 0x60d   : > { %v2143_v47 = vpop.eup %2142 }
 0x60e   : > { %v1400_v45 = vpop.permute.xlu2 %1399  ;;  %v1344_v52 = vmul.f32 %v2143_v47, %v2135_v25 }
 0x60f   : > { %1420 = vmatpush.msrb.mxu1 %v1400_v45  ;;  %v2108_v45 = vld [vmem:[%s798_s10] ss:$0 sm:$0xff] }
 0x616   : > { %v1180_v4 = vpop.permute.xlu2 %1179 }
 0x61a   : > { %v1338_v46 = vpop.xlane.xlu0 %1337 }
 0x61b   : > { %2144 = vrcp.f32 %v1338_v46 }
 0x621   : > { %v2145_v48 = vpop.eup %2144 }
 0x622   : > { %v1346_v53 = vmul.f32 %v2145_v48, %v2137_v32  ;;  %v2109_v48 = vld [vmem:[%s676_s5] ss:$0 sm:$0xff] }
 0x62d   : > { %v2101_v49 = vpop.permute.xlu0 %2100 }
 0x62e   : > { %v2103_v43 = vunpack.i.h.bf16 %v2101_v49  ;;  %v2102_v50 = vunpack.i.l.bf16 %v2101_v49 }
 0x630   : > { %1394 = vmatpush.msra.mxu0 %v2103_v43  ;;  %1446 = vmatpush.msrb.mxu2 %v2102_v50  ;;  %v1609_v50 = vld [vmem:[%s2663_s0 + $0x38] sm:$0xff] }
 0x631   : > { %1971 = vmatmul.msk.f32.vlgmr.msra.gmra.mxu0 %vm923_vm6, %v1344_v52  ;;  %1973 = vmatmul.msk.f32.vlgmr.msrb.gmra.mxu2 %vm923_vm6, %v1346_v53  ;;  %v1608_v52 = vld [vmem:[%s2663_s0 + $0x30] sm:$0xff]  ;;  %v1607_v53 = vld [vmem:[%s2663_s0 + $0x28] sm:$0xff] }
 0x632   : > { %1589 = vmatpush.msrb.mxu0 %v1566_v34  ;;  %1625 = vmatpush.msra.mxu1 %v1609_v50 }
 0x634   : > { %1590 = vmatpush.msrb.mxu0 %v1565_v35  ;;  %1626 = vmatpush.msra.mxu1 %v1608_v52 }
 0x635   : > { %v1176_v57 = vpop.permute.xlu0 %1175 }
 0x636   : > { %v1186_v0 = vsel %vm923_vm6, %v2807_v7, %v1176_v57  ;;  %1591 = vmatpush.msrb.mxu0 %v1564_v37  ;;  %1627 = vmatpush.msra.mxu1 %v1607_v53 }
 0x637   : > { %v1188_v5 = vsel %vm1187_vm10, %v1186_v0, %v1180_v4 }
 0x638   : > { %1592 = vmatpush.msrb.mxu0 %v1563_v38 }
 0x63b   : > { %v1335_v12 = vpop.xlane.xlu1 %1334 }
 0x63c   : > { %2146 = vrcp.f32 %v1335_v12  ;;  %v1606_v12 = vld [vmem:[%s2663_s0 + $0x20] sm:$0xff] }
 0x63d   : > { %v1184_v1 = vpop.permute.xlu0 %1183  ;;  %1628 = vmatpush.msra.mxu1 %v1606_v12 }
 0x63e   : > { %v1190_v6 = vsel %vm1189_vm11, %v1188_v5, %v1184_v1 }
 0x642   : > { %v2147_v54 = vpop.eup %2146 }
 0x643   : > { %v1345_v55 = vmul.f32 %v2147_v54, %v2139_v41  ;;  %v1329_v56 = vpop.xlane.xlu1 %1328  ;;  %v1605_v54 = vld [vmem:[%s2663_s0 + $0x18] sm:$0xff] }
 0x644   : > { %2148 = vrcp.f32 %v1329_v56  ;;  %1629 = vmatpush.msra.mxu1 %v1605_v54 }
 0x645   : > { %1972 = vmatmul.msk.f32.vlgmr.msrb.gmra.mxu1 %vm923_vm6, %v1345_v55 }
 0x64a   : > { %v2149_v58 = vpop.eup %2148 }
 0x64b   : > { %v1343_v59 = vmul.f32 %v2149_v58, %v2141_v26 }
 0x65b   : > { %v1348_v60 = vpop.permute.xlu1 %1347 }
 0x65c   : > { %1368 = vmatpush.msrb.mxu3 %v1348_v60  ;;  %v1604_v60 = vld [vmem:[%s2663_s0 + $0x10] sm:$0xff] }
 0x65d   : > { %1970 = vmatmul.msk.f32.vlgmr.msrb.gmra.mxu3 %vm923_vm6, %v1343_v59  ;;  %1630 = vmatpush.msra.mxu1 %v1604_v60 }
 0x65e   : > { %1488 = vmatpush.msra.mxu3 %v1469_v61  ;;  %v1603_v61 = vld [vmem:[%s2663_s0 + $0x8] sm:$0xff] }
 0x65f   : > { %1631 = vmatpush.msra.mxu1 %v1603_v61 }
 0x660   : > { %1489 = vmatpush.msra.mxu3 %v1468_v62  ;;  %v1602_v62 = vld [vmem:[%s2663_s0] sm:$0xff] }
 0x661   : > { %1632 = vmatpush.msra.mxu1 %v1602_v62 }
 0x662   : > { %1490 = vmatpush.msra.mxu3 %v1467_v63  ;;  %v2110_v63 = vld [vmem:[%s787_s20] ss:$0 sm:$0xff] }
 0x664   : > { %1491 = vmatpush.msra.mxu3 %v1466_v3 }
 0x665   : > { %1974 = vmatmul.msk.f32.vlgmr.msra.gmra.mxu3 %vm814_vm1, %v1190_v6 }
 0x6ae   : > { %v1396_v8 = vpop.f32.mrf.mxu0 }
 0x6af   : > { %1452 = vrot.lane.b32.xlu2 %v1396_v8, %s2413_s19 }
 0x6b4   : > { %v1448_v9 = vpop.f32.mrf.mxu2 }
 0x6b5   : > { %1460 = vrot.lane.b32.xlu1 %v1448_v9, %s2414_s15 }
 0x6c2   : > { %v1422_v7 = vpop.f32.mrf.mxu1 }
 0x6c3   : > { %1456 = vrot.lane.b32.xlu0 %v1422_v7, %s2412_s16 }
 0x6e0   : > { %v1370_v11 = vpop.f32.mrf.mxu3 }
 0x6e8   : > { %v1493_v14 = vpop.f32.mrf.mxu3 }
 0x6e9   : > { %v1499_v15 = vadd.f32 %v1493_v14, %v2676_v2 }
 0x6eb   : > { %v2845_v16 = vadd.f32 %v2107_v13, %v1499_v15 }
 0x6ed   : > { %v1509_v17 = vsel %vm814_vm1, %v2845_v16, 0.0 }
 0x6ee   : > { %1510 = vadd.xlane.f32.xlu2 %v1509_v17 }
 0x709   : > { %v1453_v18 = vpop.permute.xlu2 %1452 }
 0x70a   : > { %v1463_v51 = vsel %vm923_vm6, %v1370_v11, %v1453_v18 }
 0x727   : > { %v1461_v21 = vpop.permute.xlu1 %1460 }
 0x735   : > { %v1457_v19 = vpop.permute.xlu0 %1456 }
 0x736   : > { %v1464_v22 = vsel %vm1187_vm10, %v1463_v51, %v1457_v19  ;;  %v2111_v19 = vld [vmem:[%s795_s14] ss:$0 sm:$0xff]  ;;  %s3005_s14 = sld [smem:[#allocation32_spill]] (!%p1980_p3) }
 0x737   : > { %v1465_v23 = vsel %vm1189_vm11, %v1464_v22, %v1461_v21 }
 0x738   : > { %1975 = vmatmul.msk.f32.gmra.mxu3 %vm814_vm1, %v1465_v23 }
 0x761   : > { %v1511_v2 = vpop.xlane.xlu2 %1510 }
 0x762   : > { %v1515_v24 = vmul.f32 %v1511_v2, %v2680_v10 }
 0x764   : > { %v1517_v25 = vsub.f32 %v2845_v16, %v1515_v24 }
 0x766   : > { %v1519_v27 = vmul.f32 %v1517_v25, %v1517_v25 }
 0x768   : > { %v1521_v29 = vsel %vm814_vm1, %v1519_v27, 0.0 }
 0x769   : > { %1522 = vadd.xlane.f32.xlu1 %v1521_v29 }
 0x7bb   : > { %v1496_v30 = vpop.f32.mrf.mxu3 }
 0x7bc   : > { %v1500_v31 = vadd.f32 %v1496_v30, %v2689_v20 }
 0x7be   : > { %v2857_v32 = vadd.f32 %v2107_v13, %v1500_v31 }
 0x7c0   : > { %v1512_v33 = vsel %vm814_vm1, %v2857_v32, 0.0 }
 0x7c1   : > { %1513 = vadd.xlane.f32.xlu0 %v1512_v33 }
 0x7dc   : > { %v1523_v39 = vpop.xlane.xlu1 %1522 }
 0x7dd   : > { %v1527_v40 = vmul.f32 %v1523_v39, %v2680_v10 }
 0x7df   : > { %v1529_v20 = vadd.f32 1e-05, %v1527_v40 }
 0x7e1   : > { %2150 = vrsqrt.f32 %v1529_v20  ;;  %vm1537_vm13 = vweird.f32 %v1529_v20 }
 0x7e7   : > { %v2151_v41 = vpop.eup %2150 }
 0x7e8   : > { %v1532_v42 = vmul.f32 %v2151_v41, %v1529_v20  ;;  %vm1538_vm12 = vweird.f32 %v2151_v41 }
 0x7e9   : > { %vm1539_vm14 = vmor %vm1537_vm13, %vm1538_vm12 }
 0x7ea   : > { %v1533_v28 = vmul.f32 %v2151_v41, %v1532_v42 }
 0x7ec   : > { %v1534_v26 = vmul.f32 0.5, %v1533_v28 }
 0x7ee   : > { %v1535_v36 = vsub.f32 1.5, %v1534_v26 }
 0x7f0   : > { %v1536_v44 = vmul.f32 %v2151_v41, %v1535_v36 }
 0x7f2   : > { %v1540_v46 = vsel %vm1539_vm14, %v2151_v41, %v1536_v44 }
 0x7f3   : > { %v1551_v47 = vmul.f32 %v1540_v46, %v1517_v25 }
 0x7f5   : > { %v1556_v49 = vmul.f32 %v2108_v45, %v1551_v47 }
 0x7f7   : > { %v1561_v43 = vadd.f32 %v2109_v48, %v1556_v49 }
 0x7f9   : > { %1976 = vmatmul.msk.f32.vlgmr.msrb.gmra.mxu0 %vm814_vm1, %v1561_v43 }
 0x834   : > { %v1514_v55 = vpop.xlane.xlu0 %1513 }
 0x835   : > { %v1516_v56 = vmul.f32 %v1514_v55, %v2680_v10 }
 0x837   : > { %v1518_v57 = vsub.f32 %v2857_v32, %v1516_v56 }
 0x839   : > { %v1520_v58 = vmul.f32 %v1518_v57, %v1518_v57 }
 0x83b   : > { %v1524_v59 = vsel %vm814_vm1, %v1520_v58, 0.0 }
 0x83c   : > { %1525 = vadd.xlane.f32.xlu2 %v1524_v59 }
 0x876   : > { %v1594_v0 = vpop.f32.mrf.mxu0 }
 0x877   : > { %v1595_v1 = vadd.f32 %v2110_v63, %v1594_v0 }
 0x879   : > { %v1600_v3 = vmax.f32 %v1595_v1, 0.0 }
 0x87b   : > { %1978 = vmatmul.msk.f32.vlgmr.msra.gmra.mxu1 %vm1610_vm15, %v1600_v3 }
 0x8af   : > { %v1526_v4 = vpop.xlane.xlu2 %1525 }
 0x8b0   : > { %v1528_v5 = vmul.f32 %v1526_v4, %v2680_v10 }
 0x8b2   : > { %v1530_v6 = vadd.f32 1e-05, %v1528_v5 }
 0x8b4   : > { %2152 = vrsqrt.f32 %v1530_v6  ;;  %vm1547_vm2 = vweird.f32 %v1530_v6 }
 0x8ba   : > { %v2153_v8 = vpop.eup %2152 }
 0x8bb   : > { %v1542_v9 = vmul.f32 %v2153_v8, %v1530_v6  ;;  %vm1548_vm0 = vweird.f32 %v2153_v8 }
 0x8bc   : > { %vm1549_vm3 = vmor %vm1547_vm2, %vm1548_vm0 }
 0x8bd   : > { %v1543_v7 = vmul.f32 %v2153_v8, %v1542_v9 }
 0x8bf   : > { %v1544_v11 = vmul.f32 0.5, %v1543_v7 }
 0x8c1   : > { %v1545_v13 = vsub.f32 1.5, %v1544_v11 }
 0x8c3   : > { %v1546_v14 = vmul.f32 %v2153_v8, %v1545_v13 }
 0x8c5   : > { %v1550_v15 = vsel %vm1549_vm3, %v2153_v8, %v1546_v14 }
 0x8c6   : > { %v1552_v17 = vmul.f32 %v1550_v15, %v1518_v57 }
 0x8c8   : > { %v1557_v18 = vmul.f32 %v2108_v45, %v1552_v17 }
 0x8ca   : > { %v1562_v51 = vadd.f32 %v2109_v48, %v1557_v18 }
 0x8cc   : > { %1977 = vmatmul.msk.f32.gmra.mxu0 %vm814_vm1, %v1562_v51 }
 0x8f8   : > { %v1634_v21 = vpop.f32.mrf.mxu1 }
 0x8f9   : > { %v1640_v22 = vadd.f32 %v1634_v21, %v2845_v16 }
 0x8fb   : > { %v1646_v23 = vadd.f32 %v2111_v19, %v1640_v22 }
 0x8fd   : > { %1648 = vst.msk [vmem:[#allocation2] sm:$0xff] %vm814_vm1, %v1646_v23 }
 0x949   : > { %v1597_v2 = vpop.f32.mrf.mxu0 }
 0x94a   : > { %v1598_v24 = vadd.f32 %v2110_v63, %v1597_v2 }
 0x94c   : > { %v1601_v25 = vmax.f32 %v1598_v24, 0.0 }
 0x94e   : > { %1979 = vmatmul.msk.f32.gmra.mxu1 %vm1610_vm15, %v1601_v25 }
 0x9cb   : > { %v1637_v27 = vpop.f32.mrf.mxu1 }
 0x9cc   : > { %v1641_v29 = vadd.f32 %v1637_v27, %v2857_v32  ;;  %1653 = sbr.rel (%p1980_p3) target bundleno = 2790 (0xae6), region = 112 }
 0x9ce   : > { %v1647_v30 = vadd.f32 %v2111_v19, %v1641_v29 }
 0x9d0   : > { %1649 = vst.msk [vmem:[#allocation2 + $0x8] sm:$0xff] %vm814_vm1, %v1647_v30 }
 0x9d1   : > { %v1656_v31 = vsel %vm814_vm1, %v1646_v23, 0.0  ;;  %v1659_v16 = vsel %vm814_vm1, %v1647_v30, 0.0  ;;  %v2154_v12 = vld [vmem:[%s3005_s14] ss:$0 sm:$0xff] }
 0x9d2   : > { %1657 = vadd.xlane.f32.xlu0 %v1656_v31  ;;  %v2155_v56 = vld [vmem:[%s3006_s13] ss:$0 sm:$0xff] }
 0x9da   : > { %1660 = vadd.xlane.f32.xlu0 %v1659_v16 }
 0xa45   : > { %v1658_v33 = vpop.xlane.xlu0 %1657 }
 0xa46   : > { %v1662_v34 = vmul.f32 %v1658_v33, %v2680_v10 }
 0xa48   : > { %v1664_v35 = vsub.f32 %v1646_v23, %v1662_v34 }
 0xa4a   : > { %v1666_v37 = vmul.f32 %v1664_v35, %v1664_v35 }
 0xa4c   : > { %v1668_v38 = vsel %vm814_vm1, %v1666_v37, 0.0 }
 0xa4d   : > { %1669 = vadd.xlane.f32.xlu1 %v1668_v38  ;;  %v1661_v32 = vpop.xlane.xlu0 %1660 }
 0xa4e   : > { %v1663_v39 = vmul.f32 %v1661_v32, %v2680_v10 }
 0xa50   : > { %v1665_v40 = vsub.f32 %v1647_v30, %v1663_v39 }
 0xa52   : > { %v1667_v20 = vmul.f32 %v1665_v40, %v1665_v40 }
 0xa54   : > { %v1671_v41 = vsel %vm814_vm1, %v1667_v20, 0.0 }
 0xa55   : > { %1672 = vadd.xlane.f32.xlu1 %v1671_v41 }
 0xac0   : > { %v1670_v42 = vpop.xlane.xlu1 %1669 }
 0xac1   : > { %v1674_v28 = vmul.f32 %v1670_v42, %v2680_v10 }
 0xac3   : > { %v1676_v26 = vadd.f32 1e-05, %v1674_v28 }
 0xac5   : > { %2156 = vrsqrt.f32 %v1676_v26  ;;  %vm1684_vm5 = vweird.f32 %v1676_v26 }
 0xac8   : > { %v1673_v36 = vpop.xlane.xlu1 %1672 }
 0xac9   : > { %v1675_v44 = vmul.f32 %v1673_v36, %v2680_v10 }
 0xacb   : > { %v2157_v45 = vpop.eup %2156  ;;  %v1677_v46 = vadd.f32 1e-05, %v1675_v44 }
 0xacc   : > { %v1679_v47 = vmul.f32 %v2157_v45, %v1676_v26  ;;  %vm1685_vm4 = vweird.f32 %v2157_v45 }
 0xacd   : > { %2158 = vrsqrt.f32 %v1677_v46  ;;  %vm1686_vm6 = vmor %vm1684_vm5, %vm1685_vm4  ;;  %vm1694_vm8 = vweird.f32 %v1677_v46 }
 0xace   : > { %v1680_v48 = vmul.f32 %v2157_v45, %v1679_v47 }
 0xad0   : > { %v1681_v49 = vmul.f32 0.5, %v1680_v48 }
 0xad2   : > { %v1682_v43 = vsub.f32 1.5, %v1681_v49 }
 0xad3   : > { %v2159_v50 = vpop.eup %2158 }
 0xad4   : > { %v1683_v52 = vmul.f32 %v2157_v45, %v1682_v43  ;;  %v1689_v53 = vmul.f32 %v2159_v50, %v1677_v46  ;;  %vm1695_vm7 = vweird.f32 %v2159_v50 }
 0xad5   : > { %vm1696_vm9 = vmor %vm1694_vm8, %vm1695_vm7 }
 0xad6   : > { %v1687_v54 = vsel %vm1686_vm6, %v2157_v45, %v1683_v52  ;;  %v1690_v55 = vmul.f32 %v2159_v50, %v1689_v53 }
 0xad7   : > { %v1698_v10 = vmul.f32 %v1687_v54, %v1664_v35 }
 0xad8   : > { %v1691_v57 = vmul.f32 0.5, %v1690_v55 }
 0xad9   : > { %v1703_v58 = vmul.f32 %v2154_v12, %v1698_v10 }
 0xada   : > { %v1692_v59 = vsub.f32 1.5, %v1691_v57 }
 0xadb   : > { %v1708_v60 = vadd.f32 %v2155_v56, %v1703_v58 }
 0xadc   : > { %v1693_v61 = vmul.f32 %v2159_v50, %v1692_v59 }
 0xadd   : > { %1710 = vst.msk [vmem:[#allocation11] sm:$0xff] %vm814_vm1, %v1708_v60 }
 0xade   : > { %v1697_v62 = vsel %vm1696_vm9, %v2159_v50, %v1693_v61 }
 0xadf   : > { %v1699_v63 = vmul.f32 %v1697_v62, %v1665_v40 }
 0xae1   : > { %v1704_v0 = vmul.f32 %v2154_v12, %v1699_v63 }
 0xae3   : > { %v1709_v1 = vadd.f32 %v2155_v56, %v1704_v0 }
 0xae5   : > { %1711 = vst.msk [vmem:[#allocation11 + $0x8] sm:$0xff] %vm814_vm1, %v1709_v1 }
 0xae6 PF: > { %p2029_p4 = scmp.eq.s32.totalorder %s2531_s27, 1  ;;  %s3007_s28 = sld [smem:[#allocation34_spill]] }
 0xae7   : > { %s2415_s11 = smov [#allocation11]   ;;  %s2416_s30 = smov 128  }
 0xae8   : > { %s1720_s8 = sshll.u32 %s2415_s11, 4  ;;  %s1721_s8 = int_to_ptr.vmem [resolvable:$true] %s1720_s8 }
 0xaec   : > { %s1722_s29 = sshll.u32 %s3007_s28, 4  ;;  %s1723_s29 = int_to_ptr.hbm [resolvable:$true] %s1722_s29 }
 0xaed   : > { %2004 = dma.vmem_to_hbm [thread:$0]  (%p2029_p4), %s1721_s8, 256, %s1723_s29, [#allocation5], %s2416_s30, %s2416_s30, %s2413_s19  }
 0xaee   : > { %2375 = dma.done.wait (%p2029_p4), [#allocation5], 256  }
 0xaef   : > { %2377 = vsyncadd (%p2029_p4), [#allocation5], 4294967040 }
 0xaf0 PF: > { %s29_s26 = sadd.s32 1, %s2400_s26   ;;  %s3008_s16 = sld [smem:[#allocation16_spill]] }
 0xaf1   : > { %p26_p5 = scmp.ge.s32.totalorder %s29_s26, 4   ;;  %s3009_s23 = sld [smem:[#allocation19_spill]] }
 0xaf2   : > { %s3010_s24 = sld [smem:[#allocation17_spill]]  ;;  %s3012_s21 = smov %s2384_s22 }
 0xaf3   : > { %s3011_s25 = sld [smem:[#allocation18_spill]]  ;;  %28 = sbr.rel (!%p26_p5) target bundleno = 21 (0x15), region = 188 }
 0xaf6   : > { %s3013_s22 = smov %s3008_s16 }
 0xaf8   :  { %1739 = vsyncpa [#allocation4], 1 }
 0xaf9   :  { %1741 = vsyncpa [#allocation4 + $0x1], 1 }
 0xafa   :  { %1742 = vsyncpa [#allocation7], 1 }
 0xafb   :  { %1743 = vsyncpa [#allocation5], 1 }
 0xafc   :  { %1745 = vsyncpa [#allocation5 + $0x1], 1 }

</bundles_post_ra>
